<compile_context>
chip_gen: v5e
topology: v5e:2x2
jax: 0.10.0
libtpu: 0.0.40
codegen_flags: <defaults>
</compile_context>

<pallas_src>
import functools
import math

import jax
import jax.numpy as jnp
from jax.experimental import pallas as pl
from jax.experimental.pallas import tpu as pltpu


def _round_up(x, m):
    return ((x + m - 1) // m) * m


def _mlp_kernel(x_ref, w1_ref, b1_ref, w2_ref, b2_ref, o_ref, h_acc):
    """Grid = (M tiles, K tiles over input_dim). K is the reduction axis."""
    k = pl.program_id(1)

    @pl.when(k == 0)
    def _init():
        h_acc[...] = jnp.zeros_like(h_acc)

    # Layer-1 partial product on the MXU (bf16 x bf16 -> f32 accumulate).
    h_acc[...] += jnp.dot(x_ref[...], w1_ref[...],
                          preferred_element_type=jnp.float32)

    @pl.when(k == pl.num_programs(1) - 1)
    def _epilogue():
        # Single epilogue: bias + ReLU, layer 2 matmul, bias + ReLU, one
        # lane-dense store of the output tile.
        h = jnp.maximum(h_acc[...] + b1_ref[...], 0.0)
        y = jnp.dot(h.astype(w2_ref.dtype), w2_ref[...],
                    preferred_element_type=jnp.float32)
        y = jnp.maximum(y + b2_ref[...], 0.0)
        o_ref[...] = y.astype(o_ref.dtype)


@functools.partial(jax.jit, static_argnames=("tile_m", "tile_k", "compute_dtype"))
def dimension_reduction(x, w1, b1, w2, b2, *, tile_m=256, tile_k=512,
                        compute_dtype=jnp.bfloat16):
    """x: (M, D_in); w1: (D_in, 512); b1: (512,); w2: (512, D_out); b2: (D_out,).

    Weights are stored (in, out) so the kernel computes x @ W directly
    (equivalent to PyTorch's x @ W^T with W stored (out, in)).
    """
    M, D_in = x.shape
    H = w1.shape[1]
    D_out = w2.shape[1]
    out_dtype = x.dtype

    # Tile sizes: big M tile (amortize weight residency / per-step overhead),
    # but never bigger than the (128-rounded) batch.
    tile_m = min(tile_m, _round_up(M, 128))
    tile_k = min(tile_k, _round_up(D_in, 128))

    # Zero-padded, lane-dense shapes. Zero padding is exact for this MLP:
    # padded K contributes 0 to the matmul; padded H/D_out columns give
    # ReLU(0 + 0) = 0 and are sliced off; padded batch rows are sliced off.
    M_p = _round_up(M, tile_m)
    K_p = _round_up(D_in, tile_k)
    H_p = _round_up(H, 128)
    N_p = _round_up(D_out, 128)

    f32 = jnp.float32
    xc = jnp.zeros((M_p, K_p), compute_dtype).at[:M, :D_in].set(
        x.astype(compute_dtype))
    w1c = jnp.zeros((K_p, H_p), compute_dtype).at[:D_in, :H].set(
        w1.astype(compute_dtype))
    b1c = jnp.zeros((1, H_p), f32).at[:, :H].set(b1.astype(f32).reshape(1, H))
    w2c = jnp.zeros((H_p, N_p), compute_dtype).at[:H, :D_out].set(
        w2.astype(compute_dtype))
    b2c = jnp.zeros((1, N_p), f32).at[:, :D_out].set(
        b2.astype(f32).reshape(1, D_out))

    grid = (M_p // tile_m, K_p // tile_k)

    # VMEM budget: double-buffered tiles + resident f32 accumulator, with
    # headroom, capped under v7x's 64 MiB physical VMEM.
    c_sz = jnp.dtype(compute_dtype).itemsize
    o_sz = jnp.dtype(out_dtype).itemsize
    vmem_bytes = (
        2 * tile_m * tile_k * c_sz     # x tile (double buffered)
        + 2 * tile_k * H_p * c_sz      # W1 tile
        + 2 * H_p * N_p * c_sz         # W2 (whole, resident)
        + 2 * H_p * 4 + 2 * N_p * 4    # biases
        + 2 * tile_m * N_p * o_sz      # output tile
        + tile_m * H_p * 4             # f32 accumulator scratch
    )
    vmem_limit = max(min(int(vmem_bytes * 1.5) + (1 << 20), 64 * 1024 * 1024),
                     16 * 1024 * 1024)

    cost = pl.CostEstimate(
        flops=2 * M * (D_in * H + H * D_out),
        transcendentals=0,
        bytes_accessed=(xc.size * c_sz + w1c.size * c_sz + w2c.size * c_sz
                        + b1c.size * 4 + b2c.size * 4 + M_p * N_p * o_sz),
    )

    out_p = pl.pallas_call(
        _mlp_kernel,
        out_shape=jax.ShapeDtypeStruct((M_p, N_p), out_dtype),
        grid_spec=pltpu.PrefetchScalarGridSpec(
            num_scalar_prefetch=0,
            grid=grid,
            in_specs=[
                pl.BlockSpec((tile_m, tile_k), lambda i, k: (i, k)),  # x tile
                pl.BlockSpec((tile_k, H_p), lambda i, k: (k, 0)),     # W1 K-tile
                pl.BlockSpec((1, H_p), lambda i, k: (0, 0)),          # b1
                pl.BlockSpec((H_p, N_p), lambda i, k: (0, 0)),        # W2 (whole)
                pl.BlockSpec((1, N_p), lambda i, k: (0, 0)),          # b2
            ],
            out_specs=pl.BlockSpec((tile_m, N_p), lambda i, k: (i, 0)),
            scratch_shapes=[pltpu.VMEM((tile_m, H_p), jnp.float32)],
        ),
        compiler_params=pltpu.CompilerParams(
            dimension_semantics=("parallel", "arbitrary"),
            vmem_limit_bytes=vmem_limit),
        cost_estimate=cost,
    )(xc, w1c, b1c, w2c, b2c)

    return out_p[:M, :D_out]


if __name__ == "__main__":
    # Small, deterministic synthetic setup consistent with the module.
    input_dimension = 256
    hidden = 512           # fixed by the module
    target_dimension = 128
    batch = 8

    key = jax.random.PRNGKey(0)
    kx, kw1, kb1, kw2, kb2 = jax.random.split(key, 5)

    x = jax.random.normal(kx, (batch, input_dimension), dtype=jnp.float32)

    # Synthetic parameters, stored (in, out) so the kernel computes x @ W.
    w1 = jax.random.normal(kw1, (input_dimension, hidden), dtype=jnp.float32) * 0.02
    b1 = jax.random.normal(kb1, (hidden,), dtype=jnp.float32) * 0.01
    w2 = jax.random.normal(kw2, (hidden, target_dimension), dtype=jnp.float32) * 0.02
    b2 = jax.random.normal(kb2, (target_dimension,), dtype=jnp.float32) * 0.01

    out = dimension_reduction(x, w1, b1, w2, b2)
    out = jax.block_until_ready(out)
    assert out.shape == (batch, target_dimension)

    # Reference that mirrors the kernel's numerics (bf16 MXU inputs, f32 accum).
    xb = x.astype(jnp.bfloat16).astype(jnp.float32)
    w1b = w1.astype(jnp.bfloat16).astype(jnp.float32)
    w2b = w2.astype(jnp.bfloat16).astype(jnp.float32)
    ref_h = jnp.maximum(xb @ w1b + b1, 0.0)
    ref_h = ref_h.astype(jnp.bfloat16).astype(jnp.float32)
    ref = jnp.maximum(ref_h @ w2b + b2, 0.0)
    assert jnp.allclose(out, ref, atol=1e-3, rtol=1e-3), "mismatch vs bf16 reference"

    # Loose sanity check against the pure-f32 module semantics.
    ref32 = jnp.maximum(jnp.maximum(x @ w1 + b1, 0.0) @ w2 + b2, 0.0)
    assert jnp.allclose(out, ref32, atol=5e-2, rtol=5e-2), "mismatch vs f32 reference"

    print("KERNEL_OK")
</pallas_src>

<mosaic_0001>
module attributes {stable_mosaic.version = 11 : i64} {
  func.func @_mlp_kernel(%arg0: i32, %arg1: i32, %arg2: memref<128x256xbf16, #tpu.memory_space<vmem>>, %arg3: memref<256x512xbf16, #tpu.memory_space<vmem>>, %arg4: memref<1x512xf32, #tpu.memory_space<vmem>>, %arg5: memref<512x128xbf16, #tpu.memory_space<vmem>>, %arg6: memref<1x128xf32, #tpu.memory_space<vmem>>, %arg7: memref<128x128xf32, #tpu.memory_space<vmem>>, %arg8: memref<128x512xf32, #tpu.memory_space<vmem>>) attributes {dimension_semantics = [#tpu.dimension_semantics<parallel>, #tpu.dimension_semantics<arbitrary>], iteration_bounds = array<i64: 1, 1>, scalar_prefetch = 0 : i64, scratch_operands = 1 : i64, tpu.core_type = #tpu.core_type<tc>, window_params = [{transform_indices = @transform_0, window_bounds = array<i64: 128, 256>}, {transform_indices = @transform_1, window_bounds = array<i64: 256, 512>}, {pipeline_mode = #tpu.pipeline_mode<synchronous>, transform_indices = @transform_2, window_bounds = array<i64: 1, 512>}, {pipeline_mode = #tpu.pipeline_mode<synchronous>, transform_indices = @transform_3, window_bounds = array<i64: 512, 128>}, {pipeline_mode = #tpu.pipeline_mode<synchronous>, transform_indices = @transform_4, window_bounds = array<i64: 1, 128>}, {transform_indices = @transform_5, window_bounds = array<i64: 128, 128>}]} {
    %c0_i32 = arith.constant 0 : i32
    %0 = arith.cmpi eq, %arg1, %c0_i32 : i32
    %1 = arith.extui %0 : i1 to i32
    %c0_i32_0 = arith.constant 0 : i32
    %2 = arith.cmpi ne, %1, %c0_i32_0 : i32
    scf.if %2 {
      %cst_10 = arith.constant 0.000000e+00 : f32
      %12 = vector.broadcast %cst_10 : f32 to vector<128x512xf32>
      %c0_11 = arith.constant 0 : index
      %c0_12 = arith.constant 0 : index
      %13 = vector.load %arg8[%c0_11, %c0_12] : memref<128x512xf32, #tpu.memory_space<vmem>>, vector<128x512xf32>
      tpu.vector_store %arg8[%c0_11, %c0_12], %12 {strides = array<i32>} : memref<128x512xf32, #tpu.memory_space<vmem>>, vector<128x512xf32>,
    } else {
    }
    %c0 = arith.constant 0 : index
    %c0_1 = arith.constant 0 : index
    %3 = vector.load %arg8[%c0, %c0_1] : memref<128x512xf32, #tpu.memory_space<vmem>>, vector<128x512xf32>
    %c0_2 = arith.constant 0 : index
    %c0_3 = arith.constant 0 : index
    %4 = vector.load %arg2[%c0_2, %c0_3] : memref<128x256xbf16, #tpu.memory_space<vmem>>, vector<128x256xbf16>
    %c0_4 = arith.constant 0 : index
    %c0_5 = arith.constant 0 : index
    %5 = vector.load %arg3[%c0_4, %c0_5] : memref<256x512xbf16, #tpu.memory_space<vmem>>, vector<256x512xbf16>
    %cst = arith.constant dense<0.000000e+00> : vector<128x512xf32>
    %6 = tpu.matmul %4, %5, %cst {dimension_numbers = #tpu.dot_dimension_numbers<[1], [0], [0], [1], [0, 0, 1, 1], [], []>} : vector<128x256xbf16>, vector<256x512xbf16>, vector<128x512xf32> -> vector<128x512xf32>
    %7 = arith.addf %3, %6 : vector<128x512xf32>
    %c0_6 = arith.constant 0 : index
    %c0_7 = arith.constant 0 : index
    %8 = vector.load %arg8[%c0_6, %c0_7] : memref<128x512xf32, #tpu.memory_space<vmem>>, vector<128x512xf32>
    tpu.vector_store %arg8[%c0_6, %c0_7], %7 {strides = array<i32>} : memref<128x512xf32, #tpu.memory_space<vmem>>, vector<128x512xf32>,
    %c0_i32_8 = arith.constant 0 : i32
    %9 = arith.cmpi eq, %arg1, %c0_i32_8 : i32
    %10 = arith.extui %9 : i1 to i32
    %c0_i32_9 = arith.constant 0 : i32
    %11 = arith.cmpi ne, %10, %c0_i32_9 : i32
    scf.if %11 {
      %c0_10 = arith.constant 0 : index
      %c0_11 = arith.constant 0 : index
      %12 = vector.load %arg8[%c0_10, %c0_11] : memref<128x512xf32, #tpu.memory_space<vmem>>, vector<128x512xf32>
      %c0_12 = arith.constant 0 : index
      %c0_13 = arith.constant 0 : index
      %13 = vector.load %arg4[%c0_12, %c0_13] : memref<1x512xf32, #tpu.memory_space<vmem>>, vector<1x512xf32>
      %14 = vector.broadcast %13 : vector<1x512xf32> to vector<128x512xf32>
      %15 = arith.addf %12, %14 : vector<128x512xf32>
      %cst_14 = arith.constant 0.000000e+00 : f32
      %16 = vector.broadcast %cst_14 : f32 to vector<128x512xf32>
      %17 = arith.maximumf %15, %16 : vector<128x512xf32>
      %18 = arith.truncf %17 : vector<128x512xf32> to vector<128x512xbf16>
      %c0_15 = arith.constant 0 : index
      %c0_16 = arith.constant 0 : index
      %19 = vector.load %arg5[%c0_15, %c0_16] : memref<512x128xbf16, #tpu.memory_space<vmem>>, vector<512x128xbf16>
      %cst_17 = arith.constant dense<0.000000e+00> : vector<128x128xf32>
      %20 = tpu.matmul %18, %19, %cst_17 {dimension_numbers = #tpu.dot_dimension_numbers<[1], [0], [0], [1], [0, 0, 1, 1], [], []>} : vector<128x512xbf16>, vector<512x128xbf16>, vector<128x128xf32> -> vector<128x128xf32>
      %c0_18 = arith.constant 0 : index
      %c0_19 = arith.constant 0 : index
      %21 = vector.load %arg6[%c0_18, %c0_19] : memref<1x128xf32, #tpu.memory_space<vmem>>, vector<1x128xf32>
      %22 = vector.broadcast %21 : vector<1x128xf32> to vector<128x128xf32>
      %23 = arith.addf %20, %22 : vector<128x128xf32>
      %cst_20 = arith.constant 0.000000e+00 : f32
      %24 = vector.broadcast %cst_20 : f32 to vector<128x128xf32>
      %25 = arith.maximumf %23, %24 : vector<128x128xf32>
      %c0_21 = arith.constant 0 : index
      %c0_22 = arith.constant 0 : index
      %26 = vector.load %arg7[%c0_21, %c0_22] : memref<128x128xf32, #tpu.memory_space<vmem>>, vector<128x128xf32>
      tpu.vector_store %arg7[%c0_21, %c0_22], %25 {strides = array<i32>} : memref<128x128xf32, #tpu.memory_space<vmem>>, vector<128x128xf32>,
    } else {
    }
    return
  }
  func.func @transform_0(%arg0: i32, %arg1: i32) -> (i32, i32) {
    %c0_i32 = arith.constant 0 : i32
    return %arg0, %arg1 : i32, i32
  }
  func.func @transform_1(%arg0: i32, %arg1: i32) -> (i32, i32) {
    %c0_i32 = arith.constant 0 : i32
    %c0_i32_0 = arith.constant 0 : i32
    return %arg1, %c0_i32 : i32, i32
  }
  func.func @transform_2(%arg0: i32, %arg1: i32) -> (i32, i32) {
    %c0_i32 = arith.constant 0 : i32
    %c0_i32_0 = arith.constant 0 : i32
    %c0_i32_1 = arith.constant 0 : i32
    return %c0_i32, %c0_i32_0 : i32, i32
  }
  func.func @transform_3(%arg0: i32, %arg1: i32) -> (i32, i32) {
    %c0_i32 = arith.constant 0 : i32
    %c0_i32_0 = arith.constant 0 : i32
    %c0_i32_1 = arith.constant 0 : i32
    return %c0_i32, %c0_i32_0 : i32, i32
  }
  func.func @transform_4(%arg0: i32, %arg1: i32) -> (i32, i32) {
    %c0_i32 = arith.constant 0 : i32
    %c0_i32_0 = arith.constant 0 : i32
    %c0_i32_1 = arith.constant 0 : i32
    return %c0_i32, %c0_i32_0 : i32, i32
  }
  func.func @transform_5(%arg0: i32, %arg1: i32) -> (i32, i32) {
    %c0_i32 = arith.constant 0 : i32
    %c0_i32_0 = arith.constant 0 : i32
    return %arg0, %c0_i32 : i32, i32
  }
}

</mosaic_0001>

<bundles_post_ra>
// kernel: dimension_reduction.1
= control target key start
LH: loop header
LB: loop body
LE: loop exit
PB: predicated region body
PF: predicated region fallthrough
CT: control target
= control target key end

     0   :  { %s3366_s1 = inlined_call_operand.vmem [shape: bf16[256,512], index: 1, kind: input, shape index: {}]   ;;  %s3367_s0 = inlined_call_operand.vmem [shape: bf16[128,256], index: 0, kind: input, shape index: {}]   ;;  %s3368_s3 = inlined_call_operand.vmem [shape: bf16[512,128], index: 3, kind: input, shape index: {}]   ;;  %s3369_s2 = inlined_call_operand.vmem [shape: f32[1,512], index: 2, kind: input, shape index: {}]   ;;  %s3370_s4 = inlined_call_operand.vmem [shape: f32[1,128], index: 4, kind: input, shape index: {}]   ;;  %s3371_s5 = inlined_call_operand.vmem [shape: f32[128,128], index: 5, kind: output, shape index: {}]  }
   0x1   :  { %v2059_v0 = vld [vmem:[%s3366_s1 + $0xe0] sm:$0xf]  ;;  %v2375_v1 = vld [vmem:[%s3366_s1 + $0xec] sm:$0xf0]  ;;  %v2373_v5 = vld [vmem:[%s3366_s1 + $0xe4] sm:$0xf] }
   0x2   :  { %v2187_v2 = vld [vmem:[%s3366_s1 + $0x1e0] sm:$0xf]  ;;  %v2060_v3 = vor.u32 %v2375_v1, %v2059_v0  ;;  %v2407_v4 = vld [vmem:[%s3366_s1 + $0x1ec] sm:$0xf0]  ;;  %v2061_v6 = vld [vmem:[%s3366_s1 + $0xf0] sm:$0xf0] }
   0x3   :  { %v2188_v7 = vor.u32 %v2407_v4, %v2187_v2  ;;  %v2064_v8 = vor.u32 %v2373_v5, %v2061_v6  ;;  %v2405_v9 = vld [vmem:[%s3366_s1 + $0x1e4] sm:$0xf]  ;;  %v2189_v10 = vld [vmem:[%s3366_s1 + $0x1f0] sm:$0xf0]  ;;  %v2043_v11 = vld [vmem:[%s3366_s1 + $0xc0] sm:$0xf] }
   0x4   :  { %632 = vmatpush.bf16.msra.mxu0 %v2060_v3  ;;  %v2192_v12 = vor.u32 %v2405_v9, %v2189_v10  ;;  %v2371_v13 = vld [vmem:[%s3366_s1 + $0xcc] sm:$0xf0]  ;;  %v2171_v14 = vld [vmem:[%s3366_s1 + $0x1c0] sm:$0xf]  ;;  %v2369_v18 = vld [vmem:[%s3366_s1 + $0xc4] sm:$0xf] }
   0x5   :  { %v2403_v15 = vld [vmem:[%s3366_s1 + $0x1cc] sm:$0xf0]  ;;  %681 = vmatpush.bf16.msra.mxu1 %v2188_v7  ;;  %730 = vmatpush.bf16.msra.mxu2 %v2064_v8  ;;  %v2044_v16 = vor.u32 %v2371_v13, %v2043_v11  ;;  %v2045_v19 = vld [vmem:[%s3366_s1 + $0xd0] sm:$0xf0]  ;;  %v2401_v20 = vld [vmem:[%s3366_s1 + $0x1c4] sm:$0xf] }
   0x6   :  { %v2172_v17 = vor.u32 %v2403_v15, %v2171_v14  ;;  %779 = vmatpush.bf16.msra.mxu3 %v2192_v12  ;;  %v2048_v21 = vor.u32 %v2369_v18, %v2045_v19  ;;  %v2173_v22 = vld [vmem:[%s3366_s1 + $0x1d0] sm:$0xf0]  ;;  %v2027_v23 = vld [vmem:[%s3366_s1 + $0xa0] sm:$0xf]  ;;  %v2367_v24 = vld [vmem:[%s3366_s1 + $0xac] sm:$0xf0] }
   0x7   :  { %v2176_v25 = vor.u32 %v2401_v20, %v2173_v22  ;;  %v2155_v26 = vld [vmem:[%s3366_s1 + $0x1a0] sm:$0xf]  ;;  %v2399_v27 = vld [vmem:[%s3366_s1 + $0x1ac] sm:$0xf0]  ;;  %v2365_v28 = vld [vmem:[%s3366_s1 + $0xa4] sm:$0xf]  ;;  %v2028_v29 = vor.u32 %v2367_v24, %v2027_v23 }
   0x8   :  { %633 = vmatpush.bf16.msra.mxu0 %v2044_v16  ;;  %v2029_v30 = vld [vmem:[%s3366_s1 + $0xb0] sm:$0xf0]  ;;  %v2397_v31 = vld [vmem:[%s3366_s1 + $0x1a4] sm:$0xf]  ;;  %v2156_v33 = vor.u32 %v2399_v27, %v2155_v26  ;;  %v2011_v35 = vld [vmem:[%s3366_s1 + $0x80] sm:$0xf] }
   0x9   :  { %v2157_v32 = vld [vmem:[%s3366_s1 + $0x1b0] sm:$0xf0]  ;;  %682 = vmatpush.bf16.msra.mxu1 %v2172_v17  ;;  %731 = vmatpush.bf16.msra.mxu2 %v2048_v21  ;;  %v2032_v34 = vor.u32 %v2365_v28, %v2029_v30  ;;  %v2363_v36 = vld [vmem:[%s3366_s1 + $0x8c] sm:$0xf0]  ;;  %v2139_v37 = vld [vmem:[%s3366_s1 + $0x180] sm:$0xf] }
   0xa   :  { %780 = vmatpush.bf16.msra.mxu3 %v2176_v25  ;;  %v2160_v38 = vor.u32 %v2397_v31, %v2157_v32  ;;  %v2395_v39 = vld [vmem:[%s3366_s1 + $0x18c] sm:$0xf0]  ;;  %v2361_v40 = vld [vmem:[%s3366_s1 + $0x84] sm:$0xf]  ;;  %v2013_v41 = vld [vmem:[%s3366_s1 + $0x90] sm:$0xf0]  ;;  %v2012_v44 = vor.u32 %v2363_v36, %v2011_v35 }
   0xb   :  { %v2393_v42 = vld [vmem:[%s3366_s1 + $0x184] sm:$0xf]  ;;  %v2141_v43 = vld [vmem:[%s3366_s1 + $0x190] sm:$0xf0]  ;;  %v2140_v45 = vor.u32 %v2395_v39, %v2139_v37  ;;  %v2016_v46 = vor.u32 %v2361_v40, %v2013_v41  ;;  %v1995_v47 = vld [vmem:[%s3366_s1 + $0x60] sm:$0xf] }
   0xc   :  { %634 = vmatpush.bf16.msra.mxu0 %v2028_v29  ;;  %v2359_v48 = vld [vmem:[%s3366_s1 + $0x6c] sm:$0xf0]  ;;  %v2123_v49 = vld [vmem:[%s3366_s1 + $0x160] sm:$0xf]  ;;  %v2144_v50 = vor.u32 %v2393_v42, %v2141_v43  ;;  %v2357_v52 = vld [vmem:[%s3366_s1 + $0x64] sm:$0xf] }
   0xd   :  { %683 = vmatpush.bf16.msra.mxu1 %v2156_v33  ;;  %732 = vmatpush.bf16.msra.mxu2 %v2032_v34  ;;  %v2391_v51 = vld [vmem:[%s3366_s1 + $0x16c] sm:$0xf0]  ;;  %v1997_v53 = vld [vmem:[%s3366_s1 + $0x70] sm:$0xf0]  ;;  %v2389_v54 = vld [vmem:[%s3366_s1 + $0x164] sm:$0xf]  ;;  %v1996_v56 = vor.u32 %v2359_v48, %v1995_v47 }
   0xe   :  { %781 = vmatpush.bf16.msra.mxu3 %v2160_v38  ;;  %v2125_v55 = vld [vmem:[%s3366_s1 + $0x170] sm:$0xf0]  ;;  %v2124_v57 = vor.u32 %v2391_v51, %v2123_v49  ;;  %v2000_v58 = vor.u32 %v2357_v52, %v1997_v53  ;;  %v1979_v59 = vld [vmem:[%s3366_s1 + $0x40] sm:$0xf]  ;;  %v2355_v60 = vld [vmem:[%s3366_s1 + $0x4c] sm:$0xf0] }
   0xf   :  { %v2107_v61 = vld [vmem:[%s3366_s1 + $0x140] sm:$0xf]  ;;  %v2128_v62 = vor.u32 %v2389_v54, %v2125_v55  ;;  %v2387_v63 = vld [vmem:[%s3366_s1 + $0x14c] sm:$0xf0]  ;;  %v2353_v0 = vld [vmem:[%s3366_s1 + $0x44] sm:$0xf]  ;;  %v1980_v4 = vor.u32 %v2355_v60, %v1979_v59 }
  0x10   :  { %635 = vmatpush.bf16.msra.mxu0 %v2012_v44  ;;  %v1981_v1 = vld [vmem:[%s3366_s1 + $0x50] sm:$0xf0]  ;;  %v2385_v2 = vld [vmem:[%s3366_s1 + $0x144] sm:$0xf]  ;;  %v2108_v5 = vor.u32 %v2387_v63, %v2107_v61  ;;  %v1963_v7 = vld [vmem:[%s3366_s1 + $0x20] sm:$0xf] }
  0x11   :  { %684 = vmatpush.bf16.msra.mxu1 %v2140_v45  ;;  %733 = vmatpush.bf16.msra.mxu2 %v2016_v46  ;;  %v2109_v3 = vld [vmem:[%s3366_s1 + $0x150] sm:$0xf0]  ;;  %v1984_v6 = vor.u32 %v2353_v0, %v1981_v1  ;;  %v2351_v8 = vld [vmem:[%s3366_s1 + $0x2c] sm:$0xf0]  ;;  %v2091_v9 = vld [vmem:[%s3366_s1 + $0x120] sm:$0xf] }
  0x12   :  { %782 = vmatpush.bf16.msra.mxu3 %v2144_v50  ;;  %v2112_v10 = vor.u32 %v2385_v2, %v2109_v3  ;;  %v2383_v11 = vld [vmem:[%s3366_s1 + $0x12c] sm:$0xf0]  ;;  %v2349_v12 = vld [vmem:[%s3366_s1 + $0x24] sm:$0xf]  ;;  %v1965_v13 = vld [vmem:[%s3366_s1 + $0x30] sm:$0xf0]  ;;  %v1964_v16 = vor.u32 %v2351_v8, %v1963_v7 }
  0x13   :  { %v2381_v14 = vld [vmem:[%s3366_s1 + $0x124] sm:$0xf]  ;;  %v2093_v15 = vld [vmem:[%s3366_s1 + $0x130] sm:$0xf0]  ;;  %v1947_v17 = vld [vmem:[%s3366_s1] sm:$0xf]  ;;  %v2092_v19 = vor.u32 %v2383_v11, %v2091_v9  ;;  %v1968_v20 = vor.u32 %v2349_v12, %v1965_v13 }
  0x14   :  { %636 = vmatpush.bf16.msra.mxu0 %v1996_v56  ;;  %v2347_v18 = vld [vmem:[%s3366_s1 + $0xc] sm:$0xf0]  ;;  %v2075_v21 = vld [vmem:[%s3366_s1 + $0x100] sm:$0xf]  ;;  %v2345_v23 = vld [vmem:[%s3366_s1 + $0x4] sm:$0xf]  ;;  %v2096_v24 = vor.u32 %v2381_v14, %v2093_v15 }
  0x15   :  { %685 = vmatpush.bf16.msra.mxu1 %v2124_v57  ;;  %734 = vmatpush.bf16.msra.mxu2 %v2000_v58  ;;  %v2379_v22 = vld [vmem:[%s3366_s1 + $0x10c] sm:$0xf0]  ;;  %v1949_v25 = vld [vmem:[%s3366_s1 + $0x10] sm:$0xf0]  ;;  %v2377_v26 = vld [vmem:[%s3366_s1 + $0x104] sm:$0xf]  ;;  %v1948_v31 = vor.u32 %v2347_v18, %v1947_v17 }
  0x16   :  { %783 = vmatpush.bf16.msra.mxu3 %v2128_v62  ;;  %v2077_v27 = vld [vmem:[%s3366_s1 + $0x110] sm:$0xf0]  ;;  %v1883_v28 = vld [vmem:[%s3367_s0] sm:$0xf]  ;;  %v2374_v29 = vld [vmem:[%s3366_s1 + $0xec] sm:$0xf]  ;;  %v2076_v35 = vor.u32 %v2379_v22, %v2075_v21  ;;  %v1952_v36 = vor.u32 %v2345_v23, %v1949_v25 }
  0x17   :  { %v2069_v30 = vld [vmem:[%s3366_s1 + $0xf8] sm:$0xf0]  ;;  %v2330_v32 = vld [vmem:[%s3367_s0 + $0x4] sm:$0xf0]  ;;  %v2406_v33 = vld [vmem:[%s3366_s1 + $0x1ec] sm:$0xf]  ;;  %v2080_v39 = vor.u32 %v2377_v26, %v2077_v27 }
  0x18   :  { %637 = vmatpush.bf16.msra.mxu0 %v1980_v4  ;;  %v2197_v34 = vld [vmem:[%s3366_s1 + $0x1f8] sm:$0xf0]  ;;  %v2329_v37 = vld [vmem:[%s3367_s0 + $0x4] sm:$0xf]  ;;  %v1885_v38 = vld [vmem:[%s3367_s0 + $0x8] sm:$0xf0]  ;;  %v2072_v40 = vor.u32 %v2374_v29, %v2069_v30  ;;  %v2697_v44 = vor.u32 %v2330_v32, %v1883_v28 }
  0x19   :  { %686 = vmatpush.bf16.msra.mxu1 %v2108_v5  ;;  %735 = vmatpush.bf16.msra.mxu2 %v1984_v6  ;;  %v2067_v41 = vld [vmem:[%s3366_s1 + $0xe8] sm:$0xf]  ;;  %v2376_v42 = vld [vmem:[%s3366_s1 + $0xf4] sm:$0xf0]  ;;  %v2200_v45 = vor.u32 %v2406_v33, %v2197_v34  ;;  %v2370_v47 = vld [vmem:[%s3366_s1 + $0xcc] sm:$0xf]  ;;  %v2708_v49 = vor.u32 %v2329_v37, %v1885_v38 }
  0x1a   :  { %784 = vmatpush.bf16.msra.mxu3 %v2112_v10  ;;  %v2195_v43 = vld [vmem:[%s3366_s1 + $0x1e8] sm:$0xf]  ;;  %v2408_v46 = vld [vmem:[%s3366_s1 + $0x1f4] sm:$0xf0]  ;;  %v2053_v48 = vld [vmem:[%s3366_s1 + $0xd8] sm:$0xf0]  ;;  %v2068_v52 = vor.u32 %v2376_v42, %v2067_v41 }
  0x1b   :  { %v2402_v50 = vld [vmem:[%s3366_s1 + $0x1cc] sm:$0xf]  ;;  %v2181_v51 = vld [vmem:[%s3366_s1 + $0x1d8] sm:$0xf0]  ;;  %v2196_v53 = vor.u32 %v2408_v46, %v2195_v43  ;;  %v2056_v54 = vor.u32 %v2370_v47, %v2053_v48  ;;  %v2051_v55 = vld [vmem:[%s3366_s1 + $0xc8] sm:$0xf] }
  0x1c   :  { %638 = vmatpush.bf16.msra.mxu0 %v1964_v16  ;;  %v2372_v56 = vld [vmem:[%s3366_s1 + $0xd4] sm:$0xf0]  ;;  %v2184_v57 = vor.u32 %v2402_v50, %v2181_v51  ;;  %v2179_v58 = vld [vmem:[%s3366_s1 + $0x1c8] sm:$0xf]  ;;  %v2366_v61 = vld [vmem:[%s3366_s1 + $0xac] sm:$0xf] }
  0x1d   :  { %687 = vmatpush.bf16.msra.mxu1 %v2092_v19  ;;  %736 = vmatpush.bf16.msra.mxu2 %v1968_v20  ;;  %v2404_v59 = vld [vmem:[%s3366_s1 + $0x1d4] sm:$0xf0]  ;;  %v2052_v60 = vor.u32 %v2372_v56, %v2051_v55  ;;  %v2037_v62 = vld [vmem:[%s3366_s1 + $0xb8] sm:$0xf0]  ;;  %v2398_v63 = vld [vmem:[%s3366_s1 + $0x1ac] sm:$0xf] }
  0x1e   :  { %785 = vmatpush.bf16.msra.mxu3 %v2096_v24  ;;  %v2180_v0 = vor.u32 %v2404_v59, %v2179_v58  ;;  %v2040_v1 = vor.u32 %v2366_v61, %v2037_v62  ;;  %v2165_v2 = vld [vmem:[%s3366_s1 + $0x1b8] sm:$0xf0]  ;;  %v2035_v3 = vld [vmem:[%s3366_s1 + $0xa8] sm:$0xf]  ;;  %v2368_v4 = vld [vmem:[%s3366_s1 + $0xb4] sm:$0xf0] }
  0x1f   :  { %v2168_v5 = vor.u32 %v2398_v63, %v2165_v2  ;;  %v2163_v6 = vld [vmem:[%s3366_s1 + $0x1a8] sm:$0xf]  ;;  %v2400_v7 = vld [vmem:[%s3366_s1 + $0x1b4] sm:$0xf0]  ;;  %v2036_v8 = vor.u32 %v2368_v4, %v2035_v3  ;;  %v1891_v10 = vld [vmem:[%s3367_s0 + $0x10] sm:$0xf] }
  0x20   :  { %639 = vmatpush.bf16.msra.mxu0 %v1948_v31  ;;  %v2164_v9 = vor.u32 %v2400_v7, %v2163_v6  ;;  %v2332_v11 = vld [vmem:[%s3367_s0 + $0x14] sm:$0xf0]  ;;  %v2331_v12 = vld [vmem:[%s3367_s0 + $0x14] sm:$0xf]  ;;  %v1893_v13 = vld [vmem:[%s3367_s0 + $0x18] sm:$0xf0] }
  0x21   :  { %688 = vmatpush.bf16.msra.mxu1 %v2076_v35  ;;  %737 = vmatpush.bf16.msra.mxu2 %v1952_v36  ;;  %v2768_v14 = vor.u32 %v2332_v11, %v1891_v10  ;;  %v2770_v15 = vor.u32 %v2331_v12, %v1893_v13  ;;  %v2362_v16 = vld [vmem:[%s3366_s1 + $0x8c] sm:$0xf]  ;;  %v2021_v17 = vld [vmem:[%s3366_s1 + $0x98] sm:$0xf0]  ;;  %v2019_v21 = vld [vmem:[%s3366_s1 + $0x88] sm:$0xf] }
  0x22   :  { %786 = vmatpush.bf16.msra.mxu3 %v2080_v39  ;;  %v2394_v18 = vld [vmem:[%s3366_s1 + $0x18c] sm:$0xf]  ;;  %v2024_v19 = vor.u32 %v2362_v16, %v2021_v17  ;;  %v2149_v20 = vld [vmem:[%s3366_s1 + $0x198] sm:$0xf0]  ;;  %v2364_v22 = vld [vmem:[%s3366_s1 + $0x94] sm:$0xf0] }
  0x23   :  { %640 = vmatmul.bf16.vlgmr.msra.gmra.mxu0 %v2697_v44  ;;  %v2152_v23 = vor.u32 %v2394_v18, %v2149_v20  ;;  %v2020_v24 = vor.u32 %v2364_v22, %v2019_v21  ;;  %v2147_v25 = vld [vmem:[%s3366_s1 + $0x188] sm:$0xf]  ;;  %v2396_v26 = vld [vmem:[%s3366_s1 + $0x194] sm:$0xf0]  ;;  %v1899_v28 = vld [vmem:[%s3367_s0 + $0x20] sm:$0xf] }
  0x24   :  { %689 = vmatmul.bf16.vlgmr.msra.gmra.mxu1 %v2708_v49  ;;  %738 = vmatmul.bf16.vlgmr.msra.gmra.mxu2 %v2697_v44  ;;  %v2148_v27 = vor.u32 %v2396_v26, %v2147_v25  ;;  %v2334_v29 = vld [vmem:[%s3367_s0 + $0x24] sm:$0xf0]  ;;  %v2333_v30 = vld [vmem:[%s3367_s0 + $0x24] sm:$0xf]  ;;  %v1901_v31 = vld [vmem:[%s3367_s0 + $0x28] sm:$0xf0] }
  0x25   :  { %926 = vmatpush.bf16.msrb.mxu2 %v2072_v40  ;;  %787 = vmatmul.bf16.vlgmr.msra.gmra.mxu3 %v2708_v49  ;;  %v2812_v32 = vor.u32 %v2334_v29, %v1899_v28  ;;  %v2814_v33 = vor.u32 %v2333_v30, %v1901_v31  ;;  %v2358_v34 = vld [vmem:[%s3366_s1 + $0x6c] sm:$0xf]  ;;  %v2005_v35 = vld [vmem:[%s3366_s1 + $0x78] sm:$0xf0]  ;;  %v2003_v39 = vld [vmem:[%s3366_s1 + $0x68] sm:$0xf] }
  0x26   :  { %975 = vmatpush.bf16.msrb.mxu3 %v2200_v45  ;;  %828 = vmatpush.bf16.msrb.mxu0 %v2068_v52  ;;  %v2390_v36 = vld [vmem:[%s3366_s1 + $0x16c] sm:$0xf]  ;;  %v2008_v37 = vor.u32 %v2358_v34, %v2005_v35  ;;  %v2133_v38 = vld [vmem:[%s3366_s1 + $0x178] sm:$0xf0]  ;;  %v2360_v40 = vld [vmem:[%s3366_s1 + $0x74] sm:$0xf0] }
  0x27   :  { %877 = vmatpush.bf16.msrb.mxu1 %v2196_v53  ;;  %v2136_v41 = vor.u32 %v2390_v36, %v2133_v38  ;;  %v2004_v42 = vor.u32 %v2360_v40, %v2003_v39  ;;  %v2131_v43 = vld [vmem:[%s3366_s1 + $0x168] sm:$0xf]  ;;  %v2392_v45 = vld [vmem:[%s3366_s1 + $0x174] sm:$0xf0]  ;;  %v1907_v47 = vld [vmem:[%s3367_s0 + $0x30] sm:$0xf] }
  0x28   :  { %v2132_v46 = vor.u32 %v2392_v45, %v2131_v43  ;;  %v2336_v48 = vld [vmem:[%s3367_s0 + $0x34] sm:$0xf0]  ;;  %v2335_v50 = vld [vmem:[%s3367_s0 + $0x34] sm:$0xf]  ;;  %v1909_v51 = vld [vmem:[%s3367_s0 + $0x38] sm:$0xf0] }
  0x29   :  { %927 = vmatpush.bf16.msrb.mxu2 %v2056_v54  ;;  %v2856_v52 = vor.u32 %v2336_v48, %v1907_v47  ;;  %v2858_v53 = vor.u32 %v2335_v50, %v1909_v51  ;;  %v2354_v54 = vld [vmem:[%s3366_s1 + $0x4c] sm:$0xf]  ;;  %v1989_v55 = vld [vmem:[%s3366_s1 + $0x58] sm:$0xf0]  ;;  %v1987_v59 = vld [vmem:[%s3366_s1 + $0x48] sm:$0xf] }
  0x2a   :  { %976 = vmatpush.bf16.msrb.mxu3 %v2184_v57  ;;  %829 = vmatpush.bf16.msrb.mxu0 %v2052_v60  ;;  %v2386_v56 = vld [vmem:[%s3366_s1 + $0x14c] sm:$0xf]  ;;  %v1992_v57 = vor.u32 %v2354_v54, %v1989_v55  ;;  %v2117_v58 = vld [vmem:[%s3366_s1 + $0x158] sm:$0xf0]  ;;  %v2356_v60 = vld [vmem:[%s3366_s1 + $0x54] sm:$0xf0] }
  0x2b   :  { %878 = vmatpush.bf16.msrb.mxu1 %v2180_v0  ;;  %v2120_v61 = vor.u32 %v2386_v56, %v2117_v58  ;;  %v1988_v62 = vor.u32 %v2356_v60, %v1987_v59  ;;  %v2115_v63 = vld [vmem:[%s3366_s1 + $0x148] sm:$0xf]  ;;  %v2388_v0 = vld [vmem:[%s3366_s1 + $0x154] sm:$0xf0]  ;;  %v1915_v2 = vld [vmem:[%s3367_s0 + $0x40] sm:$0xf] }
  0x2c   :  { %v2338_v3 = vld [vmem:[%s3367_s0 + $0x44] sm:$0xf0]  ;;  %v2337_v4 = vld [vmem:[%s3367_s0 + $0x44] sm:$0xf]  ;;  %v2382_v10 = vld [vmem:[%s3366_s1 + $0x12c] sm:$0xf] }
  0x2d   :  { %928 = vmatpush.bf16.msrb.mxu2 %v2040_v1  ;;  %v2116_v1 = vor.u32 %v2388_v0, %v2115_v63  ;;  %v2900_v6 = vor.u32 %v2338_v3, %v1915_v2  ;;  %v2101_v12 = vld [vmem:[%s3366_s1 + $0x138] sm:$0xf0]  ;;  %v1971_v13 = vld [vmem:[%s3366_s1 + $0x28] sm:$0xf]  ;;  %v2352_v16 = vld [vmem:[%s3366_s1 + $0x34] sm:$0xf0] }
  0x2e   :  { %977 = vmatpush.bf16.msrb.mxu3 %v2168_v5  ;;  %830 = vmatpush.bf16.msrb.mxu0 %v2036_v8  ;;  %v1917_v5 = vld [vmem:[%s3367_s0 + $0x48] sm:$0xf0]  ;;  %v2104_v17 = vor.u32 %v2382_v10, %v2101_v12  ;;  %v1972_v18 = vor.u32 %v2352_v16, %v1971_v13  ;;  %v2384_v20 = vld [vmem:[%s3366_s1 + $0x134] sm:$0xf0]  ;;  %v1923_v22 = vld [vmem:[%s3367_s0 + $0x50] sm:$0xf] }
  0x2f   :  { %879 = vmatpush.bf16.msrb.mxu1 %v2164_v9  ;;  %v2902_v7 = vor.u32 %v2337_v4, %v1917_v5  ;;  %v2350_v8 = vld [vmem:[%s3366_s1 + $0x2c] sm:$0xf]  ;;  %v1973_v9 = vld [vmem:[%s3366_s1 + $0x38] sm:$0xf0]  ;;  %v1955_v35 = vld [vmem:[%s3366_s1 + $0x8] sm:$0xf] }
  0x30   :  { %v1976_v11 = vor.u32 %v2350_v8, %v1973_v9  ;;  %v1925_v25 = vld [vmem:[%s3367_s0 + $0x58] sm:$0xf0]  ;;  %v2346_v28 = vld [vmem:[%s3366_s1 + $0xc] sm:$0xf]  ;;  %v2348_v36 = vld [vmem:[%s3366_s1 + $0x14] sm:$0xf0] }
  0x31   :  { %929 = vmatpush.bf16.msrb.mxu2 %v2024_v19  ;;  %v2099_v19 = vld [vmem:[%s3366_s1 + $0x128] sm:$0xf]  ;;  %v1957_v29 = vld [vmem:[%s3366_s1 + $0x18] sm:$0xf0]  ;;  %v2378_v30 = vld [vmem:[%s3366_s1 + $0x10c] sm:$0xf]  ;;  %v1956_v38 = vor.u32 %v2348_v36, %v1955_v35 }
  0x32   :  { %978 = vmatpush.bf16.msrb.mxu3 %v2152_v23  ;;  %831 = vmatpush.bf16.msrb.mxu0 %v2020_v24  ;;  %v2100_v21 = vor.u32 %v2384_v20, %v2099_v19  ;;  %v2340_v23 = vld [vmem:[%s3367_s0 + $0x54] sm:$0xf0]  ;;  %v2339_v24 = vld [vmem:[%s3367_s0 + $0x54] sm:$0xf]  ;;  %v1960_v31 = vor.u32 %v2346_v28, %v1957_v29  ;;  %v2085_v34 = vld [vmem:[%s3366_s1 + $0x118] sm:$0xf0] }
  0x33   :  { %645 = vmatmul.bf16.gmra.mxu0 %v2768_v14  ;;  %880 = vmatpush.bf16.msrb.mxu1 %v2148_v27  ;;  %v2944_v26 = vor.u32 %v2340_v23, %v1923_v22  ;;  %v2946_v27 = vor.u32 %v2339_v24, %v1925_v25  ;;  %v2083_v39 = vld [vmem:[%s3366_s1 + $0x108] sm:$0xf]  ;;  %v2380_v40 = vld [vmem:[%s3366_s1 + $0x114] sm:$0xf0]  ;;  %v2341_v45 = vld [vmem:[%s3367_s0 + $0x64] sm:$0xf] }
  0x34   :  { %694 = vmatmul.bf16.gmra.mxu1 %v2770_v15  ;;  %743 = vmatmul.bf16.gmra.mxu2 %v2768_v14  ;;  %v2342_v43 = vld [vmem:[%s3367_s0 + $0x64] sm:$0xf0]  ;;  %v1939_v50 = vld [vmem:[%s3367_s0 + $0x70] sm:$0xf]  ;;  %v2344_v51 = vld [vmem:[%s3367_s0 + $0x74] sm:$0xf0] }
  0x35   :  { %792 = vmatmul.bf16.gmra.mxu3 %v2770_v15  ;;  %930 = vmatpush.bf16.msrb.mxu2 %v2008_v37  ;;  %v2088_v37 = vor.u32 %v2378_v30, %v2085_v34  ;;  %v2343_v54 = vld [vmem:[%s3367_s0 + $0x74] sm:$0xf]  ;;  %v1941_v55 = vld [vmem:[%s3367_s0 + $0x78] sm:$0xf0]  ;;  %v3008_v56 = vor.u32 %v2344_v51, %v1939_v50  ;;  %v2430_v35 = vld [vmem:[%s3368_s3 + $0xa8] sm:$0xff] }
  0x36   :  { %979 = vmatpush.bf16.msrb.mxu3 %v2136_v41  ;;  %832 = vmatpush.bf16.msrb.mxu0 %v2004_v42  ;;  %v2084_v41 = vor.u32 %v2380_v40, %v2083_v39  ;;  %v1931_v42 = vld [vmem:[%s3367_s0 + $0x60] sm:$0xf]  ;;  %v2432_v58 = vld [vmem:[%s3368_s3 + $0xb8] sm:$0xff]  ;;  %v2431_v3 = vld [vmem:[%s3368_s3 + $0xb0] sm:$0xff] }
  0x37   :  { %881 = vmatpush.bf16.msrb.mxu1 %v2132_v46  ;;  %v1933_v46 = vld [vmem:[%s3367_s0 + $0x68] sm:$0xf0]  ;;  %v2988_v47 = vor.u32 %v2342_v43, %v1931_v42  ;;  %v2416_v59 = vld [vmem:[%s3368_s3 + $0x38] sm:$0xff]  ;;  %v2415_v13 = vld [vmem:[%s3368_s3 + $0x30] sm:$0xff] }
  0x38   :  { %v2990_v48 = vor.u32 %v2341_v45, %v1933_v46  ;;  %v2440_v60 = vld [vmem:[%s3368_s3 + $0xf8] sm:$0xff]  ;;  %v2439_v16 = vld [vmem:[%s3368_s3 + $0xf0] sm:$0xff]  ;;  %v2438_v45 = vld [vmem:[%s3368_s3 + $0xe8] sm:$0xff] }
  0x39   :  { %931 = vmatpush.bf16.msrb.mxu2 %v1992_v57  ;;  %v3010_v57 = vor.u32 %v2343_v54, %v1941_v55  ;;  %v2423_v19 = vld [vmem:[%s3368_s3 + $0x70] sm:$0xff]  ;;  %v2422_v51 = vld [vmem:[%s3368_s3 + $0x68] sm:$0xff] }
  0x3a   :  { %980 = vmatpush.bf16.msrb.mxu3 %v2120_v61  ;;  %833 = vmatpush.bf16.msrb.mxu0 %v1988_v62  ;;  %v2424_v61 = vld [vmem:[%s3368_s3 + $0x78] sm:$0xff] }
  0x3b   :  { %882 = vmatpush.bf16.msrb.mxu1 %v2116_v1  ;;  %v3031_v1 = vld [vmem:[%s3369_s2] sm:$0xf] }
  0x3c   :  { %v3038_v2 = vperm.slane %v3031_v1, 0 }
  0x3d   :  { %932 = vmatpush.bf16.msrb.mxu2 %v1976_v11 }
  0x3e   :  { %981 = vmatpush.bf16.msrb.mxu3 %v2104_v17  ;;  %834 = vmatpush.bf16.msrb.mxu0 %v1972_v18 }
  0x3f   :  { %883 = vmatpush.bf16.msrb.mxu1 %v2100_v21 }
  0x41   :  { %933 = vmatpush.bf16.msrb.mxu2 %v1960_v31 }
  0x42   :  { %982 = vmatpush.bf16.msrb.mxu3 %v2088_v37  ;;  %835 = vmatpush.bf16.msrb.mxu0 %v1956_v38 }
  0x43   :  { %650 = vmatmul.bf16.gmra.mxu0 %v2812_v32  ;;  %884 = vmatpush.bf16.msrb.mxu1 %v2084_v41 }
  0x44   :  { %699 = vmatmul.bf16.gmra.mxu1 %v2814_v33  ;;  %748 = vmatmul.bf16.gmra.mxu2 %v2812_v32 }
  0x45   :  { %797 = vmatmul.bf16.gmra.mxu3 %v2814_v33  ;;  %1747 = vmatpush.bf16.msra.mxu2 %v2432_v58 }
  0x46   :  { %1649 = vmatpush.bf16.msra.mxu0 %v2416_v59  ;;  %1796 = vmatpush.bf16.msra.mxu3 %v2440_v60 }
  0x47   :  { %1698 = vmatpush.bf16.msra.mxu1 %v2424_v61 }
  0x49   :  { %1748 = vmatpush.bf16.msra.mxu2 %v2431_v3 }
  0x4a   :  { %1650 = vmatpush.bf16.msra.mxu0 %v2415_v13  ;;  %1797 = vmatpush.bf16.msra.mxu3 %v2439_v16 }
  0x4b   :  { %1699 = vmatpush.bf16.msra.mxu1 %v2423_v19 }
  0x4d   :  { %1749 = vmatpush.bf16.msra.mxu2 %v2430_v35 }
  0x4e   :  { %1798 = vmatpush.bf16.msra.mxu3 %v2438_v45 }
  0x4f   :  { %1700 = vmatpush.bf16.msra.mxu1 %v2422_v51 }
  0x53   :  { %655 = vmatmul.bf16.gmra.mxu0 %v2856_v52 }
  0x54   :  { %704 = vmatmul.bf16.gmra.mxu1 %v2858_v53  ;;  %753 = vmatmul.bf16.gmra.mxu2 %v2856_v52 }
  0x55   :  { %802 = vmatmul.bf16.gmra.mxu3 %v2858_v53 }
  0x63   :  { %660 = vmatmul.bf16.gmra.mxu0 %v2900_v6 }
  0x64   :  { %709 = vmatmul.bf16.gmra.mxu1 %v2902_v7  ;;  %758 = vmatmul.bf16.gmra.mxu2 %v2900_v6 }
  0x65   :  { %807 = vmatmul.bf16.gmra.mxu3 %v2902_v7 }
  0x73   :  { %665 = vmatmul.bf16.gmra.mxu0 %v2944_v26 }
  0x74   :  { %714 = vmatmul.bf16.gmra.mxu1 %v2946_v27  ;;  %763 = vmatmul.bf16.gmra.mxu2 %v2944_v26 }
  0x75   :  { %812 = vmatmul.bf16.gmra.mxu3 %v2946_v27 }
  0x83   :  { %670 = vmatmul.bf16.gmra.mxu0 %v2988_v47 }
  0x84   :  { %719 = vmatmul.bf16.gmra.mxu1 %v2990_v48  ;;  %768 = vmatmul.bf16.gmra.mxu2 %v2988_v47 }
  0x85   :  { %817 = vmatmul.bf16.gmra.mxu3 %v2990_v48 }
  0x93   :  { %675 = vmatmul.bf16.gmra.mxu0 %v3008_v56 }
  0x94   :  { %724 = vmatmul.bf16.gmra.mxu1 %v3010_v57  ;;  %773 = vmatmul.bf16.gmra.mxu2 %v3008_v56 }
  0x95   :  { %822 = vmatmul.bf16.gmra.mxu3 %v3010_v57 }
  0xa0   :  { %v641_v62 = vpop.f32.mrf.mxu0 }
  0xa1   :  { %v690_v63 = vpop.f32.mrf.mxu1 }
  0xa2   :  { %v691_v0 = vadd.f32 %v690_v63, %v641_v62 }
  0xa3   :  { %836 = vmatmul.bf16.vlgmr.msrb.gmra.mxu0 %v2697_v44 }
  0xa4   :  { %885 = vmatmul.bf16.vlgmr.msrb.gmra.mxu1 %v2708_v49  ;;  %934 = vmatmul.bf16.vlgmr.msrb.gmra.mxu2 %v2697_v44  ;;  %v1229_v11 = vadd.f32 %v3038_v2, %v691_v0 }
  0xa5   :  { %983 = vmatmul.bf16.vlgmr.msrb.gmra.mxu3 %v2708_v49  ;;  %v3046_v49 = vperm.slane %v3031_v1, 1 }
  0xa6   :  { %v1293_v17 = vmax.f32 %v1229_v11, 0.0 }
  0xa7   :  { %v739_v4 = vpop.f32.mrf.mxu2 }
  0xa8   :  { %v788_v5 = vpop.f32.mrf.mxu3  ;;  %v643_v8 = vpop.f32.mrf.mxu0 }
  0xa9   :  { %v789_v9 = vadd.f32 %v788_v5, %v739_v4  ;;  %v692_v10 = vpop.f32.mrf.mxu1  ;;  %v2429_v5 = vld [vmem:[%s3368_s3 + $0xa0] sm:$0xff] }
  0xaa   :  { %v693_v12 = vadd.f32 %v692_v10, %v643_v8  ;;  %1750 = vmatpush.bf16.msra.mxu2 %v2429_v5 }
  0xab   :  { %v1230_v24 = vadd.f32 %v3046_v49, %v789_v9 }
  0xac   :  { %v1233_v44 = vadd.f32 %v3038_v2, %v693_v12 }
  0xad   :  { %v1294_v31 = vmax.f32 %v1230_v24, 0.0 }
  0xae   :  { %v1297_v18 = vmax.f32 %v1233_v44, 0.0 }
  0xaf   :  { %v741_v20 = vpop.f32.mrf.mxu2 }
  0xb0   :  { %v3057_v21 = vpack.c.bf16 %v1297_v18, %v1293_v17  ;;  %v790_v22 = vpop.f32.mrf.mxu3  ;;  %v646_v23 = vpop.f32.mrf.mxu0  ;;  %v2437_v17 = vld [vmem:[%s3368_s3 + $0xe0] sm:$0xff] }
  0xb1   :  { %v791_v25 = vadd.f32 %v790_v22, %v741_v20  ;;  %v695_v28 = vpop.f32.mrf.mxu1  ;;  %v2421_v20 = vld [vmem:[%s3368_s3 + $0x60] sm:$0xff]  ;;  %1799 = vmatpush.bf16.msra.mxu3 %v2437_v17 }
  0xb2   :  { %v696_v29 = vadd.f32 %v695_v28, %v646_v23  ;;  %1701 = vmatpush.bf16.msra.mxu1 %v2421_v20 }
  0xb3   :  { %v1234_v30 = vadd.f32 %v3046_v49, %v791_v25  ;;  %841 = vmatmul.bf16.gmra.mxu0 %v2768_v14 }
  0xb4   :  { %890 = vmatmul.bf16.gmra.mxu1 %v2770_v15  ;;  %939 = vmatmul.bf16.gmra.mxu2 %v2768_v14  ;;  %v1237_v42 = vadd.f32 %v3038_v2, %v696_v29 }
  0xb5   :  { %v1298_v34 = vmax.f32 %v1234_v30, 0.0  ;;  %988 = vmatmul.bf16.gmra.mxu3 %v2770_v15  ;;  %v2414_v15 = vld [vmem:[%s3368_s3 + $0x28] sm:$0xff] }
  0xb6   :  { %v1301_v46 = vmax.f32 %v1237_v42, 0.0  ;;  %1651 = vmatpush.bf16.msra.mxu0 %v2414_v15 }
  0xb7   :  { %v3068_v36 = vpack.c.bf16 %v1298_v34, %v1294_v31  ;;  %v744_v37 = vpop.f32.mrf.mxu2 }
  0xb8   :  { %v793_v38 = vpop.f32.mrf.mxu3  ;;  %v648_v39 = vpop.f32.mrf.mxu0 }
  0xb9   :  { %v794_v40 = vadd.f32 %v793_v38, %v744_v37  ;;  %v697_v41 = vpop.f32.mrf.mxu1  ;;  %v2428_v38 = vld [vmem:[%s3368_s3 + $0x98] sm:$0xff] }
  0xba   :  { %v698_v43 = vadd.f32 %v697_v41, %v648_v39  ;;  %1751 = vmatpush.bf16.msra.mxu2 %v2428_v38 }
  0xbb   :  { %v1238_v60 = vadd.f32 %v3046_v49, %v794_v40 }
  0xbc   :  { %v1241_v14 = vadd.f32 %v3038_v2, %v698_v43 }
  0xbd   :  { %v1302_v3 = vmax.f32 %v1238_v60, 0.0 }
  0xbe   :  { %v1305_v50 = vmax.f32 %v1241_v14, 0.0 }
  0xbf   :  { %v746_v54 = vpop.f32.mrf.mxu2 }
  0xc0   :  { %v795_v55 = vpop.f32.mrf.mxu3  ;;  %v651_v58 = vpop.f32.mrf.mxu0  ;;  %v3081_v59 = vpack.c.bf16 %v1305_v50, %v1301_v46  ;;  %v2436_v46 = vld [vmem:[%s3368_s3 + $0xd8] sm:$0xff] }
  0xc1   :  { %v796_v61 = vadd.f32 %v795_v55, %v746_v54  ;;  %v700_v62 = vpop.f32.mrf.mxu1  ;;  %v2420_v54 = vld [vmem:[%s3368_s3 + $0x58] sm:$0xff]  ;;  %1800 = vmatpush.bf16.msra.mxu3 %v2436_v46 }
  0xc2   :  { %v701_v63 = vadd.f32 %v700_v62, %v651_v58  ;;  %1702 = vmatpush.bf16.msra.mxu1 %v2420_v54  ;;  %v2417_v54 = vld [vmem:[%s3368_s3 + $0x40] sm:$0xff] }
  0xc3   :  { %v1242_v0 = vadd.f32 %v3046_v49, %v796_v61  ;;  %846 = vmatmul.bf16.gmra.mxu0 %v2812_v32 }
  0xc4   :  { %895 = vmatmul.bf16.gmra.mxu1 %v2814_v33  ;;  %944 = vmatmul.bf16.gmra.mxu2 %v2812_v32  ;;  %v1245_v13 = vadd.f32 %v3038_v2, %v701_v63 }
  0xc5   :  { %v1306_v4 = vmax.f32 %v1242_v0, 0.0  ;;  %993 = vmatmul.bf16.gmra.mxu3 %v2814_v33  ;;  %v2413_v33 = vld [vmem:[%s3368_s3 + $0x20] sm:$0xff] }
  0xc6   :  { %v1309_v18 = vmax.f32 %v1245_v13, 0.0  ;;  %1652 = vmatpush.bf16.msra.mxu0 %v2413_v33 }
  0xc7   :  { %v749_v8 = vpop.f32.mrf.mxu2  ;;  %v3092_v9 = vpack.c.bf16 %v1306_v4, %v1302_v3 }
  0xc8   :  { %v798_v10 = vpop.f32.mrf.mxu3  ;;  %v653_v11 = vpop.f32.mrf.mxu0 }
  0xc9   :  { %v799_v12 = vadd.f32 %v798_v10, %v749_v8  ;;  %v702_v44 = vpop.f32.mrf.mxu1  ;;  %v2427_v10 = vld [vmem:[%s3368_s3 + $0x90] sm:$0xff] }
  0xca   :  { %v703_v16 = vadd.f32 %v702_v44, %v653_v11  ;;  %1752 = vmatpush.bf16.msra.mxu2 %v2427_v10 }
  0xcb   :  { %v1246_v28 = vadd.f32 %v3046_v49, %v799_v12 }
  0xcc   :  { %v1249_v32 = vadd.f32 %v3038_v2, %v703_v16 }
  0xcd   :  { %v1310_v35 = vmax.f32 %v1246_v28, 0.0 }
  0xce   :  { %v1313_v19 = vmax.f32 %v1249_v32, 0.0 }
  0xcf   :  { %v751_v22 = vpop.f32.mrf.mxu2 }
  0xd0   :  { %v800_v23 = vpop.f32.mrf.mxu3  ;;  %v656_v24 = vpop.f32.mrf.mxu0  ;;  %v3105_v25 = vpack.c.bf16 %v1313_v19, %v1309_v18  ;;  %v2435_v18 = vld [vmem:[%s3368_s3 + $0xd0] sm:$0xff] }
  0xd1   :  { %v801_v29 = vadd.f32 %v800_v23, %v751_v22  ;;  %v705_v30 = vpop.f32.mrf.mxu1  ;;  %v2419_v22 = vld [vmem:[%s3368_s3 + $0x50] sm:$0xff]  ;;  %1801 = vmatpush.bf16.msra.mxu3 %v2435_v18 }
  0xd2   :  { %v706_v31 = vadd.f32 %v705_v30, %v656_v24  ;;  %1703 = vmatpush.bf16.msra.mxu1 %v2419_v22 }
  0xd3   :  { %v1250_v34 = vadd.f32 %v3046_v49, %v801_v29  ;;  %851 = vmatmul.bf16.gmra.mxu0 %v2856_v52 }
  0xd4   :  { %900 = vmatmul.bf16.gmra.mxu1 %v2858_v53  ;;  %949 = vmatmul.bf16.gmra.mxu2 %v2856_v52  ;;  %v1253_v15 = vadd.f32 %v3038_v2, %v706_v31 }
  0xd5   :  { %v1314_v37 = vmax.f32 %v1250_v34, 0.0  ;;  %998 = vmatmul.bf16.gmra.mxu3 %v2858_v53  ;;  %v2412_v53 = vld [vmem:[%s3368_s3 + $0x18] sm:$0xff]  ;;  %v2426_v34 = vld [vmem:[%s3368_s3 + $0x88] sm:$0xff] }
  0xd6   :  { %v1317_v50 = vmax.f32 %v1253_v15, 0.0  ;;  %1653 = vmatpush.bf16.msra.mxu0 %v2412_v53  ;;  %1753 = vmatpush.bf16.msra.mxu2 %v2426_v34  ;;  %v2434_v15 = vld [vmem:[%s3368_s3 + $0xc8] sm:$0xff] }
  0xd7   :  { %v754_v39 = vpop.f32.mrf.mxu2  ;;  %v3116_v40 = vpack.c.bf16 %v1314_v37, %v1310_v35  ;;  %1802 = vmatpush.bf16.msra.mxu3 %v2434_v15 }
  0xd8   :  { %v803_v41 = vpop.f32.mrf.mxu3  ;;  %v658_v42 = vpop.f32.mrf.mxu0 }
  0xd9   :  { %v804_v43 = vadd.f32 %v803_v41, %v754_v39  ;;  %v707_v14 = vpop.f32.mrf.mxu1 }
  0xda   :  { %v708_v45 = vadd.f32 %v707_v14, %v658_v42 }
  0xdb   :  { %v1254_v62 = vadd.f32 %v3046_v49, %v804_v43 }
  0xdc   :  { %v1257_v52 = vadd.f32 %v3038_v2, %v708_v45 }
  0xdd   :  { %v1318_v5 = vmax.f32 %v1254_v62, 0.0  ;;  %v2425_v62 = vld [vmem:[%s3368_s3 + $0x80] sm:$0xff] }
  0xde   :  { %v1321_v51 = vmax.f32 %v1257_v52, 0.0  ;;  %1754 = vmatpush.bf16.msra.mxu2 %v2425_v62 }
  0xdf   :  { %v756_v55 = vpop.f32.mrf.mxu2 }
  0xe0   :  { %v805_v58 = vpop.f32.mrf.mxu3  ;;  %v661_v60 = vpop.f32.mrf.mxu0  ;;  %v3129_v61 = vpack.c.bf16 %v1321_v51, %v1317_v50  ;;  %v2409_v51 = vld [vmem:[%s3368_s3] sm:$0xff] }
  0xe1   :  { %v806_v63 = vadd.f32 %v805_v58, %v756_v55  ;;  %v710_v0 = vpop.f32.mrf.mxu1 }
  0xe2   :  { %v711_v3 = vadd.f32 %v710_v0, %v661_v60 }
  0xe3   :  { %v1258_v4 = vadd.f32 %v3046_v49, %v806_v63  ;;  %856 = vmatmul.bf16.gmra.mxu0 %v2900_v6 }
  0xe4   :  { %905 = vmatmul.bf16.gmra.mxu1 %v2902_v7  ;;  %954 = vmatmul.bf16.gmra.mxu2 %v2900_v6  ;;  %v1261_v33 = vadd.f32 %v3038_v2, %v711_v3 }
  0xe5   :  { %v1322_v8 = vmax.f32 %v1258_v4, 0.0  ;;  %1003 = vmatmul.bf16.gmra.mxu3 %v2902_v7  ;;  %v2411_v7 = vld [vmem:[%s3368_s3 + $0x10] sm:$0xff] }
  0xe6   :  { %v1325_v19 = vmax.f32 %v1261_v33, 0.0  ;;  %1654 = vmatpush.bf16.msra.mxu0 %v2411_v7 }
  0xe7   :  { %v759_v11 = vpop.f32.mrf.mxu2  ;;  %v3140_v12 = vpack.c.bf16 %v1322_v8, %v1318_v5 }
  0xe8   :  { %v808_v44 = vpop.f32.mrf.mxu3  ;;  %v663_v13 = vpop.f32.mrf.mxu0 }
  0xe9   :  { %v3142_v16 = vadd.f32 %v808_v44, %v759_v11  ;;  %v712_v32 = vpop.f32.mrf.mxu1 }
  0xea   :  { %v713_v6 = vadd.f32 %v712_v32, %v663_v13 }
  0xec   :  { %v1265_v17 = vadd.f32 %v3038_v2, %v713_v6 }
  0xee   :  { %v1329_v20 = vmax.f32 %v1265_v17, 0.0 }
  0xef   :  { %v3155_v23 = vpop.f32.mrf.mxu2 }
  0xf0   :  { %v3157_v24 = vpop.f32.mrf.mxu3  ;;  %v666_v28 = vpop.f32.mrf.mxu0  ;;  %v3159_v29 = vpack.c.bf16 %v1329_v20, %v1325_v19 }
  0xf1   :  { %v715_v30 = vpop.f32.mrf.mxu1 }
  0xf2   :  { %v716_v31 = vadd.f32 %v715_v30, %v666_v28 }
  0xf3   :  { %861 = vmatmul.bf16.gmra.mxu0 %v2944_v26 }
  0xf4   :  { %910 = vmatmul.bf16.gmra.mxu1 %v2946_v27  ;;  %959 = vmatmul.bf16.gmra.mxu2 %v2944_v26  ;;  %v1269_v42 = vadd.f32 %v3038_v2, %v716_v31  ;;  %v2410_v26 = vld [vmem:[%s3368_s3 + $0x8] sm:$0xff] }
  0xf5   :  { %1008 = vmatmul.bf16.gmra.mxu3 %v2946_v27  ;;  %v2418_v27 = vld [vmem:[%s3368_s3 + $0x48] sm:$0xff]  ;;  %1655 = vmatpush.bf16.msra.mxu0 %v2410_v26 }
  0xf6   :  { %v1333_v45 = vmax.f32 %v1269_v42, 0.0  ;;  %1704 = vmatpush.bf16.msra.mxu1 %v2418_v27 }
  0xf7   :  { %v764_v35 = vpop.f32.mrf.mxu2 }
  0xf8   :  { %v813_v37 = vpop.f32.mrf.mxu3  ;;  %v668_v38 = vpop.f32.mrf.mxu0 }
  0xf9   :  { %v3168_v39 = vadd.f32 %v813_v37, %v764_v35  ;;  %v717_v41 = vpop.f32.mrf.mxu1  ;;  %1656 = vmatpush.bf16.msra.mxu0 %v2409_v51 }
  0xfa   :  { %v718_v43 = vadd.f32 %v717_v41, %v668_v38  ;;  %1705 = vmatpush.bf16.msra.mxu1 %v2417_v54  ;;  %v3235_v54 = vperm.slane %v3031_v1, 3 }
  0xfc   :  { %v1273_v14 = vadd.f32 %v3038_v2, %v718_v43 }
  0xfe   :  { %v1337_v52 = vmax.f32 %v1273_v14, 0.0  ;;  %v3230_v14 = vperm.slane %v3031_v1, 2 }
  0xff   :  { %v3181_v53 = vpop.f32.mrf.mxu2 }
 0x100   :  { %v3183_v46 = vpop.f32.mrf.mxu3  ;;  %v671_v50 = vpop.f32.mrf.mxu0  ;;  %v3191_v55 = vpack.c.bf16 %v1337_v52, %v1333_v45 }
 0x101   :  { %v720_v58 = vpop.f32.mrf.mxu1 }
 0x102   :  { %v721_v60 = vadd.f32 %v720_v58, %v671_v50 }
 0x103   :  { %866 = vmatmul.bf16.gmra.mxu0 %v2988_v47 }
 0x104   :  { %915 = vmatmul.bf16.gmra.mxu1 %v2990_v48  ;;  %964 = vmatmul.bf16.gmra.mxu2 %v2988_v47  ;;  %v1277_v8 = vadd.f32 %v3038_v2, %v721_v60  ;;  %v2433_v47 = vld [vmem:[%s3368_s3 + $0xc0] sm:$0xff] }
 0x105   :  { %1013 = vmatmul.bf16.gmra.mxu3 %v2990_v48 }
 0x106   :  { %v1341_v48 = vmax.f32 %v1277_v8, 0.0  ;;  %1803 = vmatpush.bf16.msra.mxu3 %v2433_v47 }
 0x107   :  { %v769_v63 = vpop.f32.mrf.mxu2 }
 0x108   :  { %v818_v0 = vpop.f32.mrf.mxu3  ;;  %v673_v3 = vpop.f32.mrf.mxu0 }
 0x109   :  { %v3200_v4 = vadd.f32 %v818_v0, %v769_v63  ;;  %v722_v5 = vpop.f32.mrf.mxu1 }
 0x10a   :  { %v723_v10 = vadd.f32 %v722_v5, %v673_v3 }
 0x10c   :  { %v1281_v11 = vadd.f32 %v3038_v2, %v723_v10 }
 0x10e   :  { %v1345_v44 = vmax.f32 %v1281_v11, 0.0 }
 0x10f   :  { %v3207_v13 = vpop.f32.mrf.mxu2 }
 0x110   :  { %v3209_v32 = vpop.f32.mrf.mxu3  ;;  %v676_v33 = vpop.f32.mrf.mxu0  ;;  %v3211_v6 = vpack.c.bf16 %v1345_v44, %v1341_v48 }
 0x111   :  { %v725_v17 = vpop.f32.mrf.mxu1 }
 0x112   :  { %v726_v7 = vadd.f32 %v725_v17, %v676_v33 }
 0x113   :  { %871 = vmatmul.bf16.gmra.mxu0 %v3008_v56 }
 0x114   :  { %920 = vmatmul.bf16.gmra.mxu1 %v3010_v57  ;;  %969 = vmatmul.bf16.gmra.mxu2 %v3008_v56  ;;  %v1285_v30 = vadd.f32 %v3038_v2, %v726_v7 }
 0x115   :  { %1018 = vmatmul.bf16.gmra.mxu3 %v3010_v57 }
 0x116   :  { %v1349_v35 = vmax.f32 %v1285_v30, 0.0 }
 0x117   :  { %v774_v18 = vpop.f32.mrf.mxu2 }
 0x118   :  { %v823_v19 = vpop.f32.mrf.mxu3  ;;  %v678_v20 = vpop.f32.mrf.mxu0 }
 0x119   :  { %v3217_v22 = vadd.f32 %v823_v19, %v774_v18  ;;  %v727_v28 = vpop.f32.mrf.mxu1 }
 0x11a   :  { %v728_v31 = vadd.f32 %v727_v28, %v678_v20 }
 0x11c   :  { %v1289_v34 = vadd.f32 %v3038_v2, %v728_v31 }
 0x11e   :  { %v1353_v37 = vmax.f32 %v1289_v34, 0.0 }
 0x11f   :  { %v3221_v38 = vpop.f32.mrf.mxu2 }
 0x120   :  { %v3223_v41 = vpop.f32.mrf.mxu3  ;;  %v837_v56 = vpop.f32.mrf.mxu0  ;;  %v3225_v42 = vpack.c.bf16 %v1353_v37, %v1349_v35 }
 0x121   :  { %v886_v57 = vpop.f32.mrf.mxu1 }
 0x122   :  { %v887_v43 = vadd.f32 %v886_v57, %v837_v56 }
 0x123   :  { %1657 = vmatmul.bf16.vlgmr.msra.gmra.mxu0 %v3057_v21 }
 0x124   :  { %1706 = vmatmul.bf16.vlgmr.msra.gmra.mxu1 %v3068_v36  ;;  %v1231_v45 = vadd.f32 %v3230_v14, %v887_v43 }
 0x126   :  { %v1295_v21 = vmax.f32 %v1231_v45, 0.0 }
 0x127   :  { %v935_v26 = vpop.f32.mrf.mxu2 }
 0x128   :  { %v984_v2 = vpop.f32.mrf.mxu3  ;;  %v839_v27 = vpop.f32.mrf.mxu0 }
 0x129   :  { %v888_v15 = vpop.f32.mrf.mxu1  ;;  %v985_v51 = vadd.f32 %v984_v2, %v935_v26 }
 0x12a   :  { %v889_v52 = vadd.f32 %v888_v15, %v839_v27 }
 0x12b   :  { %v1232_v0 = vadd.f32 %v3235_v54, %v985_v51 }
 0x12c   :  { %v1235_v50 = vadd.f32 %v3230_v14, %v889_v52 }
 0x12d   :  { %v1296_v10 = vmax.f32 %v1232_v0, 0.0 }
 0x12e   :  { %v1299_v58 = vmax.f32 %v1235_v50, 0.0 }
 0x12f   :  { %v937_v36 = vpop.f32.mrf.mxu2 }
 0x130   :  { %v1359_v60 = vpack.c.bf16 %v1299_v58, %v1295_v21  ;;  %v986_v62 = vpop.f32.mrf.mxu3  ;;  %v842_v63 = vpop.f32.mrf.mxu0 }
 0x131   :  { %v987_v3 = vadd.f32 %v986_v62, %v937_v36  ;;  %v891_v5 = vpop.f32.mrf.mxu1 }
 0x132   :  { %1755 = vmatmul.bf16.vlgmr.msra.gmra.mxu2 %v1359_v60  ;;  %v892_v11 = vadd.f32 %v891_v5, %v842_v63 }
 0x133   :  { %v1236_v8 = vadd.f32 %v3235_v54, %v987_v3  ;;  %1662 = vmatmul.bf16.gmra.mxu0 %v3081_v59 }
 0x134   :  { %1711 = vmatmul.bf16.gmra.mxu1 %v3092_v9  ;;  %v1239_v7 = vadd.f32 %v3230_v14, %v892_v11 }
 0x135   :  { %v1300_v1 = vmax.f32 %v1236_v8, 0.0 }
 0x136   :  { %v1303_v28 = vmax.f32 %v1239_v7, 0.0 }
 0x137   :  { %v1360_v47 = vpack.c.bf16 %v1300_v1, %v1296_v10  ;;  %v940_v48 = vpop.f32.mrf.mxu2 }
 0x138   :  { %v989_v44 = vpop.f32.mrf.mxu3  ;;  %v844_v33 = vpop.f32.mrf.mxu0 }
 0x139   :  { %1804 = vmatmul.bf16.vlgmr.msra.gmra.mxu3 %v1360_v47  ;;  %v893_v17 = vpop.f32.mrf.mxu1  ;;  %v990_v20 = vadd.f32 %v989_v44, %v940_v48  ;;  %v811_v47 = vadd.f32 %v3157_v24, %v3155_v23 }
 0x13a   :  { %v894_v18 = vadd.f32 %v893_v17, %v844_v33 }
 0x13b   :  { %v1240_v35 = vadd.f32 %v3235_v54, %v990_v20 }
 0x13c   :  { %v1243_v19 = vadd.f32 %v3230_v14, %v894_v18 }
 0x13d   :  { %v1304_v43 = vmax.f32 %v1240_v35, 0.0 }
 0x13e   :  { %v1307_v30 = vmax.f32 %v1243_v19, 0.0  ;;  %v1266_v19 = vadd.f32 %v3046_v49, %v811_v47 }
 0x13f   :  { %v942_v59 = vpop.f32.mrf.mxu2 }
 0x140   :  { %v991_v31 = vpop.f32.mrf.mxu3  ;;  %v847_v9 = vpop.f32.mrf.mxu0  ;;  %v1363_v34 = vpack.c.bf16 %v1307_v30, %v1303_v28 }
 0x141   :  { %v992_v37 = vadd.f32 %v991_v31, %v942_v59  ;;  %v896_v56 = vpop.f32.mrf.mxu1  ;;  %v1330_v59 = vmax.f32 %v1266_v19, 0.0 }
 0x142   :  { %1760 = vmatmul.bf16.gmra.mxu2 %v1363_v34  ;;  %v897_v2 = vadd.f32 %v896_v56, %v847_v9 }
 0x143   :  { %v1244_v57 = vadd.f32 %v3235_v54, %v992_v37  ;;  %1667 = vmatmul.bf16.gmra.mxu0 %v3105_v25 }
 0x144   :  { %1716 = vmatmul.bf16.gmra.mxu1 %v3116_v40  ;;  %v1247_v51 = vadd.f32 %v3230_v14, %v897_v2 }
 0x145   :  { %v1308_v26 = vmax.f32 %v1244_v57, 0.0 }
 0x146   :  { %v1311_v60 = vmax.f32 %v1247_v51, 0.0 }
 0x147   :  { %v945_v27 = vpop.f32.mrf.mxu2  ;;  %v1364_v15 = vpack.c.bf16 %v1308_v26, %v1304_v43 }
 0x148   :  { %v994_v45 = vpop.f32.mrf.mxu3  ;;  %v849_v52 = vpop.f32.mrf.mxu0 }
 0x149   :  { %1809 = vmatmul.bf16.gmra.mxu3 %v1364_v15  ;;  %v898_v50 = vpop.f32.mrf.mxu1  ;;  %v995_v36 = vadd.f32 %v994_v45, %v945_v27  ;;  %v816_v15 = vadd.f32 %v3183_v46, %v3181_v53 }
 0x14a   :  { %v899_v21 = vadd.f32 %v898_v50, %v849_v52 }
 0x14b   :  { %v1248_v3 = vadd.f32 %v3235_v54, %v995_v36  ;;  %v1274_v36 = vadd.f32 %v3046_v49, %v816_v15  ;;  %v826_v15 = vadd.f32 %v3223_v41, %v3221_v38 }
 0x14c   :  { %v1251_v58 = vadd.f32 %v3230_v14, %v899_v21 }
 0x14d   :  { %v1312_v1 = vmax.f32 %v1248_v3, 0.0 }
 0x14e   :  { %v1315_v62 = vmax.f32 %v1251_v58, 0.0 }
 0x14f   :  { %v947_v25 = vpop.f32.mrf.mxu2 }
 0x150   :  { %v996_v63 = vpop.f32.mrf.mxu3  ;;  %v852_v40 = vpop.f32.mrf.mxu0  ;;  %v1367_v0 = vpack.c.bf16 %v1315_v62, %v1311_v60 }
 0x151   :  { %v997_v5 = vadd.f32 %v996_v63, %v947_v25  ;;  %v901_v8 = vpop.f32.mrf.mxu1 }
 0x152   :  { %1765 = vmatmul.bf16.gmra.mxu2 %v1367_v0  ;;  %v902_v48 = vadd.f32 %v901_v8, %v852_v40  ;;  %v1338_v40 = vmax.f32 %v1274_v36, 0.0  ;;  %v1290_v36 = vadd.f32 %v3046_v49, %v826_v15 }
 0x153   :  { %v1252_v10 = vadd.f32 %v3235_v54, %v997_v5  ;;  %1672 = vmatmul.bf16.gmra.mxu0 %v3129_v61  ;;  %v1262_v61 = vadd.f32 %v3046_v49, %v3142_v16 }
 0x154   :  { %1721 = vmatmul.bf16.gmra.mxu1 %v3140_v12  ;;  %v1255_v20 = vadd.f32 %v3230_v14, %v902_v48 }
 0x155   :  { %v1316_v11 = vmax.f32 %v1252_v10, 0.0  ;;  %v1326_v9 = vmax.f32 %v1262_v61, 0.0 }
 0x156   :  { %v1319_v23 = vmax.f32 %v1255_v20, 0.0 }
 0x157   :  { %v950_v44 = vpop.f32.mrf.mxu2  ;;  %v1368_v33 = vpack.c.bf16 %v1316_v11, %v1312_v1  ;;  %v1374_v26 = vpack.c.bf16 %v1330_v59, %v1326_v9 }
 0x158   :  { %v999_v17 = vpop.f32.mrf.mxu3  ;;  %v854_v7 = vpop.f32.mrf.mxu0 }
 0x159   :  { %1814 = vmatmul.bf16.gmra.mxu3 %v1368_v33  ;;  %v903_v18 = vpop.f32.mrf.mxu1  ;;  %v1000_v30 = vadd.f32 %v999_v17, %v950_v44  ;;  %v821_v17 = vadd.f32 %v3209_v32, %v3207_v13 }
 0x15a   :  { %v904_v28 = vadd.f32 %v903_v18, %v854_v7 }
 0x15b   :  { %v1256_v56 = vadd.f32 %v3235_v54, %v1000_v30 }
 0x15c   :  { %v1259_v12 = vadd.f32 %v3230_v14, %v904_v28 }
 0x15d   :  { %v1320_v16 = vmax.f32 %v1256_v56, 0.0 }
 0x15e   :  { %v1323_v24 = vmax.f32 %v1259_v12, 0.0  ;;  %v1282_v12 = vadd.f32 %v3046_v49, %v821_v17 }
 0x15f   :  { %v952_v31 = vpop.f32.mrf.mxu2 }
 0x160   :  { %v1001_v34 = vpop.f32.mrf.mxu3  ;;  %v857_v35 = vpop.f32.mrf.mxu0  ;;  %v1371_v37 = vpack.c.bf16 %v1323_v24, %v1319_v23 }
 0x161   :  { %v1002_v57 = vadd.f32 %v1001_v34, %v952_v31  ;;  %v906_v43 = vpop.f32.mrf.mxu1  ;;  %v1346_v31 = vmax.f32 %v1282_v12, 0.0 }
 0x162   :  { %1770 = vmatmul.bf16.gmra.mxu2 %v1371_v37  ;;  %v907_v45 = vadd.f32 %v906_v43, %v857_v35 }
 0x163   :  { %v1260_v2 = vadd.f32 %v3235_v54, %v1002_v57  ;;  %1677 = vmatmul.bf16.gmra.mxu0 %v3159_v29  ;;  %v1270_v29 = vadd.f32 %v3046_v49, %v3168_v39 }
 0x164   :  { %1726 = vmatmul.bf16.gmra.mxu1 %v1374_v26  ;;  %v1263_v60 = vadd.f32 %v3230_v14, %v907_v45 }
 0x165   :  { %v1324_v27 = vmax.f32 %v1260_v2, 0.0  ;;  %v1334_v3 = vmax.f32 %v1270_v29, 0.0 }
 0x166   :  { %v1327_v53 = vmax.f32 %v1263_v60, 0.0 }
 0x167   :  { %v955_v52 = vpop.f32.mrf.mxu2  ;;  %v1372_v50 = vpack.c.bf16 %v1324_v27, %v1320_v16  ;;  %v1378_v48 = vpack.c.bf16 %v1338_v40, %v1334_v3 }
 0x168   :  { %v1004_v51 = vpop.f32.mrf.mxu3  ;;  %v859_v21 = vpop.f32.mrf.mxu0 }
 0x169   :  { %1819 = vmatmul.bf16.gmra.mxu3 %v1372_v50  ;;  %v908_v58 = vpop.f32.mrf.mxu1  ;;  %v1005_v63 = vadd.f32 %v1004_v51, %v955_v52 }
 0x16a   :  { %v909_v62 = vadd.f32 %v908_v58, %v859_v21 }
 0x16b   :  { %v1264_v1 = vadd.f32 %v3235_v54, %v1005_v63  ;;  %v1354_v63 = vmax.f32 %v1290_v36, 0.0 }
 0x16c   :  { %v1267_v25 = vadd.f32 %v3230_v14, %v909_v62 }
 0x16d   :  { %v1328_v39 = vmax.f32 %v1264_v1, 0.0 }
 0x16e   :  { %v1331_v46 = vmax.f32 %v1267_v25, 0.0 }
 0x16f   :  { %v957_v0 = vpop.f32.mrf.mxu2 }
 0x170   :  { %v1006_v5 = vpop.f32.mrf.mxu3  ;;  %v862_v8 = vpop.f32.mrf.mxu0  ;;  %v1375_v10 = vpack.c.bf16 %v1331_v46, %v1327_v53 }
 0x171   :  { %v1007_v11 = vadd.f32 %v1006_v5, %v957_v0  ;;  %v911_v47 = vpop.f32.mrf.mxu1 }
 0x172   :  { %1775 = vmatmul.bf16.gmra.mxu2 %v1375_v10  ;;  %v912_v7 = vadd.f32 %v911_v47, %v862_v8 }
 0x173   :  { %v1268_v44 = vadd.f32 %v3235_v54, %v1007_v11  ;;  %1682 = vmatmul.bf16.gmra.mxu0 %v3191_v55  ;;  %v1278_v55 = vadd.f32 %v3046_v49, %v3200_v4 }
 0x174   :  { %1731 = vmatmul.bf16.gmra.mxu1 %v1378_v48  ;;  %v1271_v30 = vadd.f32 %v3230_v14, %v912_v7 }
 0x175   :  { %v1332_v33 = vmax.f32 %v1268_v44, 0.0  ;;  %v1342_v34 = vmax.f32 %v1278_v55, 0.0 }
 0x176   :  { %v1335_v13 = vmax.f32 %v1271_v30, 0.0 }
 0x177   :  { %v960_v18 = vpop.f32.mrf.mxu2  ;;  %v1376_v19 = vpack.c.bf16 %v1332_v33, %v1328_v39  ;;  %v1382_v2 = vpack.c.bf16 %v1346_v31, %v1342_v34 }
 0x178   :  { %v1009_v20 = vpop.f32.mrf.mxu3  ;;  %v864_v28 = vpop.f32.mrf.mxu0 }
 0x179   :  { %1824 = vmatmul.bf16.gmra.mxu3 %v1376_v19  ;;  %v913_v61 = vpop.f32.mrf.mxu1  ;;  %v1010_v24 = vadd.f32 %v1009_v20, %v960_v18 }
 0x17a   :  { %v914_v59 = vadd.f32 %v913_v61, %v864_v28 }
 0x17b   :  { %v1272_v57 = vadd.f32 %v3235_v54, %v1010_v24 }
 0x17c   :  { %v1275_v23 = vadd.f32 %v3230_v14, %v914_v59 }
 0x17d   :  { %v1336_v4 = vmax.f32 %v1272_v57, 0.0 }
 0x17e   :  { %v1339_v32 = vmax.f32 %v1275_v23, 0.0 }
 0x17f   :  { %v962_v9 = vpop.f32.mrf.mxu2 }
 0x180   :  { %v1011_v35 = vpop.f32.mrf.mxu3  ;;  %v867_v37 = vpop.f32.mrf.mxu0  ;;  %v1379_v56 = vpack.c.bf16 %v1339_v32, %v1335_v13 }
 0x181   :  { %v1012_v43 = vadd.f32 %v1011_v35, %v962_v9  ;;  %v916_v26 = vpop.f32.mrf.mxu1 }
 0x182   :  { %1780 = vmatmul.bf16.gmra.mxu2 %v1379_v56  ;;  %v917_v45 = vadd.f32 %v916_v26, %v867_v37  ;;  %v3300_v37 = vld [vmem:[%s3370_s4] ss:$0 sm:$0xff] }
 0x183   :  { %v1276_v16 = vadd.f32 %v3235_v54, %v1012_v43  ;;  %1687 = vmatmul.bf16.gmra.mxu0 %v3211_v6  ;;  %v1286_v6 = vadd.f32 %v3046_v49, %v3217_v22 }
 0x184   :  { %1736 = vmatmul.bf16.gmra.mxu1 %v1382_v2  ;;  %v1279_v60 = vadd.f32 %v3230_v14, %v917_v45 }
 0x185   :  { %v1340_v27 = vmax.f32 %v1276_v16, 0.0  ;;  %v1350_v53 = vmax.f32 %v1286_v6, 0.0 }
 0x186   :  { %v1343_v38 = vmax.f32 %v1279_v60, 0.0 }
 0x187   :  { %v965_v52 = vpop.f32.mrf.mxu2  ;;  %v1380_v50 = vpack.c.bf16 %v1340_v27, %v1336_v4  ;;  %v1386_v1 = vpack.c.bf16 %v1354_v63, %v1350_v53 }
 0x188   :  { %v1014_v51 = vpop.f32.mrf.mxu3  ;;  %v869_v21 = vpop.f32.mrf.mxu0 }
 0x189   :  { %1829 = vmatmul.bf16.gmra.mxu3 %v1380_v50  ;;  %v918_v58 = vpop.f32.mrf.mxu1  ;;  %v1015_v25 = vadd.f32 %v1014_v51, %v965_v52 }
 0x18a   :  { %v919_v62 = vadd.f32 %v918_v58, %v869_v21 }
 0x18b   :  { %v1280_v5 = vadd.f32 %v3235_v54, %v1015_v25 }
 0x18c   :  { %v1283_v29 = vadd.f32 %v3230_v14, %v919_v62 }
 0x18d   :  { %v1344_v49 = vmax.f32 %v1280_v5, 0.0 }
 0x18e   :  { %v1347_v41 = vmax.f32 %v1283_v29, 0.0 }
 0x18f   :  { %v967_v40 = vpop.f32.mrf.mxu2 }
 0x190   :  { %v1016_v46 = vpop.f32.mrf.mxu3  ;;  %v872_v0 = vpop.f32.mrf.mxu0  ;;  %v1383_v3 = vpack.c.bf16 %v1347_v41, %v1343_v38 }
 0x191   :  { %v1017_v8 = vadd.f32 %v1016_v46, %v967_v40  ;;  %v921_v10 = vpop.f32.mrf.mxu1 }
 0x192   :  { %1785 = vmatmul.bf16.gmra.mxu2 %v1383_v3  ;;  %v922_v47 = vadd.f32 %v921_v10, %v872_v0 }
 0x193   :  { %v1284_v11 = vadd.f32 %v3235_v54, %v1017_v8  ;;  %1692 = vmatmul.bf16.gmra.mxu0 %v3225_v42 }
 0x194   :  { %1741 = vmatmul.bf16.gmra.mxu1 %v1386_v1  ;;  %v1287_v7 = vadd.f32 %v3230_v14, %v922_v47 }
 0x195   :  { %v1348_v22 = vmax.f32 %v1284_v11, 0.0 }
 0x196   :  { %v1351_v28 = vmax.f32 %v1287_v7, 0.0 }
 0x197   :  { %v970_v48 = vpop.f32.mrf.mxu2  ;;  %v1384_v44 = vpack.c.bf16 %v1348_v22, %v1344_v49 }
 0x198   :  { %v1019_v39 = vpop.f32.mrf.mxu3  ;;  %v874_v33 = vpop.f32.mrf.mxu0 }
 0x199   :  { %1834 = vmatmul.bf16.gmra.mxu3 %v1384_v44  ;;  %v923_v17 = vpop.f32.mrf.mxu1  ;;  %v1020_v20 = vadd.f32 %v1019_v39, %v970_v48 }
 0x19a   :  { %v924_v18 = vadd.f32 %v923_v17, %v874_v33 }
 0x19b   :  { %v1288_v55 = vadd.f32 %v3235_v54, %v1020_v20 }
 0x19c   :  { %v1291_v19 = vadd.f32 %v3230_v14, %v924_v18 }
 0x19d   :  { %v1352_v13 = vmax.f32 %v1288_v55, 0.0 }
 0x19e   :  { %v1355_v61 = vmax.f32 %v1291_v19, 0.0 }
 0x19f   :  { %v972_v12 = vpop.f32.mrf.mxu2 }
 0x1a0   :  { %v1021_v42 = vpop.f32.mrf.mxu3  ;;  %v1658_v30 = vpop.f32.mrf.mxu0  ;;  %v1387_v59 = vpack.c.bf16 %v1355_v61, %v1351_v28 }
 0x1a1   :  { %v1022_v23 = vadd.f32 %v1021_v42, %v972_v12  ;;  %v1707_v24 = vpop.f32.mrf.mxu1  ;;  %v1659_v57 = vadd.f32 %v3300_v37, %v1658_v30 }
 0x1a2   :  { %1790 = vmatmul.bf16.gmra.mxu2 %v1387_v59 }
 0x1a3   :  { %v1292_v31 = vadd.f32 %v3235_v54, %v1022_v23  ;;  %v1708_v2 = vadd.f32 %v1707_v24, %v1659_v57 }
 0x1a5   :  { %v1356_v32 = vmax.f32 %v1292_v31, 0.0 }
 0x1a7   :  { %v1388_v9 = vpack.c.bf16 %v1356_v32, %v1352_v13 }
 0x1a8   :  { %v1660_v34 = vpop.f32.mrf.mxu0 }
 0x1a9   :  { %1839 = vmatmul.bf16.gmra.mxu3 %v1388_v9  ;;  %v1709_v14 = vpop.f32.mrf.mxu1  ;;  %v1661_v27 = vadd.f32 %v3300_v37, %v1660_v34 }
 0x1ab   :  { %v1710_v51 = vadd.f32 %v1709_v14, %v1661_v27 }
 0x1b0   :  { %v1663_v35 = vpop.f32.mrf.mxu0 }
 0x1b1   :  { %v1712_v56 = vpop.f32.mrf.mxu1  ;;  %v1664_v60 = vadd.f32 %v3300_v37, %v1663_v35 }
 0x1b3   :  { %v1713_v63 = vadd.f32 %v1712_v56, %v1664_v60 }
 0x1b5   :  { %v1756_v43 = vpop.f32.mrf.mxu2 }
 0x1b6   :  { %v1757_v54 = vadd.f32 %v1756_v43, %v1708_v2 }
 0x1b8   :  { %v1665_v26 = vpop.f32.mrf.mxu0 }
 0x1b9   :  { %v1714_v16 = vpop.f32.mrf.mxu1  ;;  %v1666_v53 = vadd.f32 %v3300_v37, %v1665_v26 }
 0x1bb   :  { %v1715_v8 = vadd.f32 %v1714_v16, %v1666_v53 }
 0x1bc   :  { %v1805_v4 = vpop.f32.mrf.mxu3 }
 0x1bd   :  { %v1806_v15 = vadd.f32 %v1805_v4, %v1757_v54  ;;  %v1758_v45 = vpop.f32.mrf.mxu2 }
 0x1be   :  { %v1759_v58 = vadd.f32 %v1758_v45, %v1710_v51 }
 0x1bf   :  { %v1845_v52 = vmax.f32 %v1806_v15, 0.0 }
 0x1c0   :  { %v1668_v50 = vpop.f32.mrf.mxu0 }
 0x1c1   :  { %1861 = vst [vmem:[%s3371_s5] sm:$0xff] %v1845_v52  ;;  %v1717_v21 = vpop.f32.mrf.mxu1  ;;  %v1669_v11 = vadd.f32 %v3300_v37, %v1668_v50 }
 0x1c3   :  { %v1718_v44 = vadd.f32 %v1717_v21, %v1669_v11 }
 0x1c4   :  { %v1807_v36 = vpop.f32.mrf.mxu3 }
 0x1c5   :  { %v1808_v62 = vadd.f32 %v1807_v36, %v1759_v58  ;;  %v1761_v6 = vpop.f32.mrf.mxu2 }
 0x1c6   :  { %v1762_v38 = vadd.f32 %v1761_v6, %v1713_v63 }
 0x1c7   :  { %v1846_v29 = vmax.f32 %v1808_v62, 0.0 }
 0x1c8   :  { %v1670_v25 = vpop.f32.mrf.mxu0 }
 0x1c9   :  { %1862 = vst [vmem:[%s3371_s5 + $0x8] sm:$0xff] %v1846_v29  ;;  %v1719_v41 = vpop.f32.mrf.mxu1  ;;  %v1671_v7 = vadd.f32 %v3300_v37, %v1670_v25 }
 0x1cb   :  { %v1720_v61 = vadd.f32 %v1719_v41, %v1671_v7 }
 0x1cc   :  { %v1810_v40 = vpop.f32.mrf.mxu3 }
 0x1cd   :  { %v1811_v46 = vadd.f32 %v1810_v40, %v1762_v38  ;;  %v1763_v0 = vpop.f32.mrf.mxu2 }
 0x1ce   :  { %v1764_v10 = vadd.f32 %v1763_v0, %v1715_v8 }
 0x1cf   :  { %v1847_v3 = vmax.f32 %v1811_v46, 0.0 }
 0x1d0   :  { %v1673_v5 = vpop.f32.mrf.mxu0 }
 0x1d1   :  { %1863 = vst [vmem:[%s3371_s5 + $0x10] sm:$0xff] %v1847_v3  ;;  %v1722_v47 = vpop.f32.mrf.mxu1  ;;  %v1674_v59 = vadd.f32 %v3300_v37, %v1673_v5 }
 0x1d3   :  { %v1723_v31 = vadd.f32 %v1722_v47, %v1674_v59 }
 0x1d4   :  { %v1812_v1 = vpop.f32.mrf.mxu3 }
 0x1d5   :  { %v1813_v49 = vadd.f32 %v1812_v1, %v1764_v10  ;;  %v1766_v22 = vpop.f32.mrf.mxu2 }
 0x1d6   :  { %v1767_v33 = vadd.f32 %v1766_v22, %v1718_v44 }
 0x1d7   :  { %v1848_v48 = vmax.f32 %v1813_v49, 0.0 }
 0x1d8   :  { %v1675_v39 = vpop.f32.mrf.mxu0 }
 0x1d9   :  { %1864 = vst [vmem:[%s3371_s5 + $0x18] sm:$0xff] %v1848_v48  ;;  %v1724_v28 = vpop.f32.mrf.mxu1  ;;  %v1676_v34 = vadd.f32 %v3300_v37, %v1675_v39 }
 0x1db   :  { %v1725_v43 = vadd.f32 %v1724_v28, %v1676_v34 }
 0x1dc   :  { %v1815_v17 = vpop.f32.mrf.mxu3 }
 0x1dd   :  { %v1816_v18 = vadd.f32 %v1815_v17, %v1767_v33  ;;  %v1768_v19 = vpop.f32.mrf.mxu2 }
 0x1de   :  { %v1769_v12 = vadd.f32 %v1768_v19, %v1720_v61 }
 0x1df   :  { %v1849_v20 = vmax.f32 %v1816_v18, 0.0 }
 0x1e0   :  { %v1678_v42 = vpop.f32.mrf.mxu0 }
 0x1e1   :  { %1865 = vst [vmem:[%s3371_s5 + $0x20] sm:$0xff] %v1849_v20  ;;  %v1727_v13 = vpop.f32.mrf.mxu1  ;;  %v1679_v54 = vadd.f32 %v3300_v37, %v1678_v42 }
 0x1e3   :  { %v1728_v52 = vadd.f32 %v1727_v13, %v1679_v54 }
 0x1e4   :  { %v1817_v30 = vpop.f32.mrf.mxu3 }
 0x1e5   :  { %v1818_v55 = vadd.f32 %v1817_v30, %v1769_v12  ;;  %v1771_v23 = vpop.f32.mrf.mxu2 }
 0x1e6   :  { %v1772_v32 = vadd.f32 %v1771_v23, %v1723_v31 }
 0x1e7   :  { %v1850_v24 = vmax.f32 %v1818_v55, 0.0 }
 0x1e8   :  { %v1680_v56 = vpop.f32.mrf.mxu0 }
 0x1e9   :  { %1866 = vst [vmem:[%s3371_s5 + $0x28] sm:$0xff] %v1850_v24  ;;  %v1729_v2 = vpop.f32.mrf.mxu1  ;;  %v1681_v21 = vadd.f32 %v3300_v37, %v1680_v56 }
 0x1eb   :  { %v1730_v6 = vadd.f32 %v1729_v2, %v1681_v21 }
 0x1ec   :  { %v1820_v9 = vpop.f32.mrf.mxu3 }
 0x1ed   :  { %v1821_v14 = vadd.f32 %v1820_v9, %v1772_v32  ;;  %v1773_v35 = vpop.f32.mrf.mxu2 }
 0x1ee   :  { %v1774_v26 = vadd.f32 %v1773_v35, %v1725_v43 }
 0x1ef   :  { %v1851_v57 = vmax.f32 %v1821_v14, 0.0 }
 0x1f0   :  { %v1683_v45 = vpop.f32.mrf.mxu0 }
 0x1f1   :  { %1867 = vst [vmem:[%s3371_s5 + $0x30] sm:$0xff] %v1851_v57  ;;  %v1732_v60 = vpop.f32.mrf.mxu1  ;;  %v1684_v38 = vadd.f32 %v3300_v37, %v1683_v45 }
 0x1f3   :  { %v1733_v0 = vadd.f32 %v1732_v60, %v1684_v38 }
 0x1f4   :  { %v1822_v16 = vpop.f32.mrf.mxu3 }
 0x1f5   :  { %v1823_v4 = vadd.f32 %v1822_v16, %v1774_v26  ;;  %v1776_v27 = vpop.f32.mrf.mxu2 }
 0x1f6   :  { %v1777_v50 = vadd.f32 %v1776_v27, %v1728_v52 }
 0x1f7   :  { %v1852_v15 = vmax.f32 %v1823_v4, 0.0 }
 0x1f8   :  { %v1685_v29 = vpop.f32.mrf.mxu0 }
 0x1f9   :  { %1868 = vst [vmem:[%s3371_s5 + $0x38] sm:$0xff] %v1852_v15  ;;  %v1734_v46 = vpop.f32.mrf.mxu1  ;;  %v1686_v10 = vadd.f32 %v3300_v37, %v1685_v29 }
 0x1fb   :  { %v1735_v22 = vadd.f32 %v1734_v46, %v1686_v10 }
 0x1fc   :  { %v1825_v51 = vpop.f32.mrf.mxu3 }
 0x1fd   :  { %v1826_v58 = vadd.f32 %v1825_v51, %v1777_v50  ;;  %v1778_v36 = vpop.f32.mrf.mxu2 }
 0x1fe   :  { %v1779_v25 = vadd.f32 %v1778_v36, %v1730_v6 }
 0x1ff   :  { %v1853_v62 = vmax.f32 %v1826_v58, 0.0 }
 0x200   :  { %v1688_v5 = vpop.f32.mrf.mxu0 }
 0x201   :  { %1869 = vst [vmem:[%s3371_s5 + $0x40] sm:$0xff] %v1853_v62  ;;  %v1737_v47 = vpop.f32.mrf.mxu1  ;;  %v1689_v39 = vadd.f32 %v3300_v37, %v1688_v5 }
 0x203   :  { %v1738_v19 = vadd.f32 %v1737_v47, %v1689_v39 }
 0x204   :  { %v1827_v63 = vpop.f32.mrf.mxu3 }
 0x205   :  { %v1828_v41 = vadd.f32 %v1827_v63, %v1779_v25  ;;  %v1781_v40 = vpop.f32.mrf.mxu2 }
 0x206   :  { %v1782_v3 = vadd.f32 %v1781_v40, %v1733_v0 }
 0x207   :  { %v1854_v53 = vmax.f32 %v1828_v41, 0.0 }
 0x208   :  { %v1690_v7 = vpop.f32.mrf.mxu0 }
 0x209   :  { %1870 = vst [vmem:[%s3371_s5 + $0x48] sm:$0xff] %v1854_v53  ;;  %v1739_v28 = vpop.f32.mrf.mxu1  ;;  %v1691_v12 = vadd.f32 %v3300_v37, %v1690_v7 }
 0x20b   :  { %v1740_v23 = vadd.f32 %v1739_v28, %v1691_v12 }
 0x20c   :  { %v1830_v8 = vpop.f32.mrf.mxu3 }
 0x20d   :  { %v1831_v1 = vadd.f32 %v1830_v8, %v1782_v3  ;;  %v1783_v11 = vpop.f32.mrf.mxu2 }
 0x20e   :  { %v1784_v48 = vadd.f32 %v1783_v11, %v1735_v22 }
 0x20f   :  { %v1855_v49 = vmax.f32 %v1831_v1, 0.0 }
 0x210   :  { %v1693_v55 = vpop.f32.mrf.mxu0 }
 0x211   :  { %1871 = vst [vmem:[%s3371_s5 + $0x50] sm:$0xff] %v1855_v49  ;;  %v1694_v13 = vadd.f32 %v3300_v37, %v1693_v55  ;;  %v1742_v9 = vpop.f32.mrf.mxu1 }
 0x213   :  { %v1743_v35 = vadd.f32 %v1742_v9, %v1694_v13 }
 0x214   :  { %v1832_v44 = vpop.f32.mrf.mxu3 }
 0x215   :  { %v1833_v33 = vadd.f32 %v1832_v44, %v1784_v48  ;;  %v1786_v17 = vpop.f32.mrf.mxu2 }
 0x216   :  { %v1787_v20 = vadd.f32 %v1786_v17, %v1738_v19 }
 0x217   :  { %v1856_v18 = vmax.f32 %v1833_v33, 0.0 }
 0x218   :  { %v1695_v56 = vpop.f32.mrf.mxu0 }
 0x219   :  { %1872 = vst [vmem:[%s3371_s5 + $0x58] sm:$0xff] %v1856_v18  ;;  %v1696_v26 = vadd.f32 %v3300_v37, %v1695_v56  ;;  %v1744_v54 = vpop.f32.mrf.mxu1 }
 0x21b   :  { %v1745_v27 = vadd.f32 %v1744_v54, %v1696_v26 }
 0x21c   :  { %v1835_v61 = vpop.f32.mrf.mxu3 }
 0x21d   :  { %v1836_v42 = vadd.f32 %v1835_v61, %v1787_v20  ;;  %v1788_v30 = vpop.f32.mrf.mxu2 }
 0x21e   :  { %v1789_v24 = vadd.f32 %v1788_v30, %v1740_v23 }
 0x21f   :  { %v1857_v59 = vmax.f32 %v1836_v42, 0.0 }
 0x221   :  { %1873 = vst [vmem:[%s3371_s5 + $0x60] sm:$0xff] %v1857_v59 }
 0x224   :  { %v1837_v31 = vpop.f32.mrf.mxu3 }
 0x225   :  { %v1838_v32 = vadd.f32 %v1837_v31, %v1789_v24  ;;  %v1791_v34 = vpop.f32.mrf.mxu2 }
 0x226   :  { %v1792_v57 = vadd.f32 %v1791_v34, %v1743_v35 }
 0x227   :  { %v1858_v14 = vmax.f32 %v1838_v32, 0.0 }
 0x229   :  { %1874 = vst [vmem:[%s3371_s5 + $0x68] sm:$0xff] %v1858_v14 }
 0x22c   :  { %v1840_v43 = vpop.f32.mrf.mxu3 }
 0x22d   :  { %v1841_v2 = vadd.f32 %v1840_v43, %v1792_v57  ;;  %v1793_v4 = vpop.f32.mrf.mxu2 }
 0x22e   :  { %v1794_v15 = vadd.f32 %v1793_v4, %v1745_v27 }
 0x22f   :  { %v1859_v16 = vmax.f32 %v1841_v2, 0.0 }
 0x231   :  { %1875 = vst [vmem:[%s3371_s5 + $0x70] sm:$0xff] %v1859_v16 }
 0x234   :  { %v1842_v45 = vpop.f32.mrf.mxu3 }
 0x235   :  { %v1843_v52 = vadd.f32 %v1842_v45, %v1794_v15 }
 0x237   :  { %v1860_v50 = vmax.f32 %v1843_v52, 0.0 }
 0x239   :  { %1876 = vst [vmem:[%s3371_s5 + $0x78] sm:$0xff] %v1860_v50 }

</bundles_post_ra>
